<compile_context>
chip_gen: v7x
topology: tpu7x:2x2x1
jax: 0.10.0
libtpu: 0.0.40
codegen_flags: <defaults>
</compile_context>

<pallas_src>
import functools

import jax
import jax.numpy as jnp
import numpy as np
from jax.experimental import pallas as pl
from jax.experimental.pallas import tpu as pltpu

ENC_LAYERS = 10  # 4 encoder linears + 3 smooth blocks x 2 linears


def _round_up(n, m):
    return ((n + m - 1) // m) * m


# ----------------------------------------------------------------------------
# Fused kernel: grid=(2,) -> step 0 = mic branch, step 1 = dis branch + epilogue
# ----------------------------------------------------------------------------
def fused_kernel(n_mic, n_dis, batch, seg0_pad, batch_pad, *refs):
    # refs = (tau_smem, x_branch, <W0,b0,...,W9,b9>, sim_out, loss_out, lat_scratch)
    tau_ref, x_ref = refs[0], refs[1]
    params = refs[2:2 + 2 * ENC_LAYERS]
    sim_ref, loss_ref, lat_ref = refs[-3], refs[-2], refs[-1]

    b = pl.program_id(0)

    def lin(h, i):
        # bf16 operands on the MXU, f32 accumulation; bias stays f32.
        return (jnp.dot(h.astype(jnp.bfloat16), params[2 * i][...],
                        preferred_element_type=jnp.float32)
                + params[2 * i + 1][...])

    # Encoder: in -> 512 -> 256 -> 64 -> latent (activations kept in f32).
    h = jax.nn.relu(lin(x_ref[...], 0))
    h = jax.nn.relu(lin(h, 1))
    h = jax.nn.relu(lin(h, 2))
    z = lin(h, 3)
    # Residual smooth blocks (shared weights): z <- z + Linear(ReLU(Linear(z)))
    for blk in range(3):
        base = 4 + 2 * blk
        z = z + lin(jax.nn.relu(lin(z, base)), base + 1)

    @pl.when(b == 0)
    def _():
        # Stash mic-branch latents; zero the grid-resident outputs.
        lat_ref[...] = z
        sim_ref[...] = jnp.zeros_like(sim_ref)
        loss_ref[...] = jnp.zeros_like(loss_ref)

    @pl.when(b == 1)
    def _():
        mic_all = lat_ref[...]   # mic-branch latents (written at step 0)
        dis_all = z              # dis-branch latents (this step)

        # Static, sublane-aligned row slices of each latent block.
        mic_lat = mic_all[:n_mic]
        mi = mic_all[seg0_pad:seg0_pad + batch]
        mih = mic_all[seg0_pad + batch_pad:seg0_pad + batch_pad + batch]
        dis_lat = dis_all[:n_dis]
        dj = dis_all[seg0_pad:seg0_pad + batch]
        djh = dis_all[seg0_pad + batch_pad:seg0_pad + batch_pad + batch]

        # similarity = mic_lat @ dis_lat.T (contract last dims of both operands;
        # no transposed copy is materialized).
        s = jax.lax.dot_general(mic_lat, dis_lat,
                                dimension_numbers=(((1,), (1,)), ((), ())),
                                preferred_element_type=jnp.float32)
        s_min = jnp.min(s, keepdims=True)
        s_max = jnp.max(s, keepdims=True)
        # NOTE: mirrors the PyTorch reference -> NaN/Inf if s is constant.
        sim_ref[...] = (s - s_min) / (s_max - s_min)

        def l2n(v):
            # F.normalize(v, p=2, dim=1) with torch's eps=1e-12 clamp.
            nrm = jnp.sqrt(jnp.sum(v * v, axis=1, keepdims=True))
            return v / jnp.maximum(nrm, 1e-12)

        mi_n, mih_n, dj_n, djh_n = l2n(mi), l2n(mih), l2n(dj), l2n(djh)
        inv_tau = 1.0 / tau_ref[0, 0]
        # diag(mm(z1, z2.T)) == row-wise dot products.
        xa = jnp.sum(mi_n * dj_n, axis=1, keepdims=True) * inv_tau
        xb = jnp.sum(mi_n * djh_n, axis=1, keepdims=True) * inv_tau
        xc = jnp.sum(mih_n * dj_n, axis=1, keepdims=True) * inv_tau
        # -log(exp(xa)/(exp(xa)+exp(xb)+exp(xc))) == logsumexp(xa,xb,xc) - xa
        m = jnp.maximum(jnp.maximum(xa, xb), xc)
        lse = m + jnp.log(jnp.exp(xa - m) + jnp.exp(xb - m) + jnp.exp(xc - m))
        loss_ref[...] = jnp.mean(lse - xa, keepdims=True)


# ----------------------------------------------------------------------------
# Wrapper: one pallas_call, grid=(2,) over branches, stacked per-branch weights
# ----------------------------------------------------------------------------
def micro_disease_forward(mic_feat, dis_feat, mic_i, mic_i_hat, dis_j, dis_j_hat,
                          tau, stacked_params):
    n_mic = mic_feat.shape[0]
    n_dis = dis_feat.shape[0]
    batch = mic_i.shape[0]

    d_in = stacked_params[0].shape[1]          # padded, lane-dense input dim
    latent_dim = stacked_params[-1].shape[-1]
    seg0_pad = _round_up(max(n_mic, n_dis), 8)
    batch_pad = _round_up(batch, 8)
    rows = seg0_pad + 2 * batch_pad

    def branch_rows(feat, a, a_hat):
        def pad(x, r):
            return jnp.pad(x, ((0, r - x.shape[0]), (0, d_in - x.shape[1])))
        # Zero-padded rows/cols just produce unused latent rows / zero partials.
        return jnp.concatenate(
            [pad(feat, seg0_pad), pad(a, batch_pad), pad(a_hat, batch_pad)], axis=0)

    x_all = jnp.stack([branch_rows(mic_feat, mic_i, mic_i_hat),
                       branch_rows(dis_feat, dis_j, dis_j_hat)],
                      axis=0).astype(jnp.bfloat16)          # (2, rows, d_in)
    tau_arr = jnp.asarray(tau, jnp.float32).reshape(1, 1)

    def branch_spec(shape):
        # Leading branch axis is selected by the grid index and squeezed away.
        return pl.BlockSpec((None,) + tuple(shape), lambda i: (i, 0, 0))

    in_specs = [pl.BlockSpec(memory_space=pltpu.MemorySpace.SMEM),
                branch_spec((rows, d_in))]
    for p in stacked_params:
        in_specs.append(branch_spec(p.shape[1:]))

    kernel = functools.partial(fused_kernel, n_mic, n_dis, batch,
                               seg0_pad, batch_pad)

    sim, loss = pl.pallas_call(
        kernel,
        out_shape=(
            jax.ShapeDtypeStruct((n_mic, n_dis), jnp.float32),
            jax.ShapeDtypeStruct((1, 1), jnp.float32),
        ),
        grid_spec=pltpu.PrefetchScalarGridSpec(
            num_scalar_prefetch=0,
            grid=(2,),
            in_specs=in_specs,
            out_specs=(pl.BlockSpec((n_mic, n_dis), lambda i: (0, 0)),
                       pl.BlockSpec((1, 1), lambda i: (0, 0))),
            scratch_shapes=[pltpu.VMEM((rows, latent_dim), jnp.float32)]),
        compiler_params=pltpu.CompilerParams(
            # Outputs/scratch carried across the branch axis -> "arbitrary".
            dimension_semantics=("arbitrary",),
            # Resident footprint ~1.5 MB; keep the scoped reservation modest.
            vmem_limit_bytes=8 * 1024 * 1024),
    )(tau_arr, x_all, *stacked_params)
    return sim, loss[0, 0]


# ----------------------------------------------------------------------------
# Parameter construction (deterministic, mimics torch Linear uniform init)
# ----------------------------------------------------------------------------
def init_linear(key, in_dim, out_dim):
    k_w, k_b = jax.random.split(key)
    bound = 1.0 / np.sqrt(in_dim)
    w = jax.random.uniform(k_w, (in_dim, out_dim), jnp.float32, -bound, bound)
    b = jax.random.uniform(k_b, (1, out_dim), jnp.float32, -bound, bound)
    return w, b


def make_encoder_params(key, input_dim, latent_dim):
    dims = [(input_dim, 512), (512, 256), (256, 64), (64, latent_dim)]
    keys = jax.random.split(key, len(dims))
    return [init_linear(k, di, do) for k, (di, do) in zip(keys, dims)]


def make_smooth_params(key, latent_dim):
    keys = jax.random.split(key, 6)
    return [init_linear(k, latent_dim, latent_dim) for k in keys]


def stack_branch_params(mic_enc, dis_enc, smooth, d_in_pad):
    """Stack per-layer (mic, dis) weights along a leading axis of 2.

    Layer-0 weights are zero-padded along the input dim to d_in_pad; the
    smooth blocks are shared between branches (same tensors in both slots),
    matching the PyTorch module.
    """
    mic_layers = mic_enc + smooth
    dis_layers = dis_enc + smooth
    stacked = []
    for layer, ((wm, bm), (wd, bd)) in enumerate(zip(mic_layers, dis_layers)):
        if layer == 0:
            wm = jnp.pad(wm, ((0, d_in_pad - wm.shape[0]), (0, 0)))
            wd = jnp.pad(wd, ((0, d_in_pad - wd.shape[0]), (0, 0)))
        stacked.append(jnp.stack([wm, wd], axis=0).astype(jnp.bfloat16))
        stacked.append(jnp.stack([bm, bd], axis=0).astype(jnp.float32))
    return stacked


if __name__ == "__main__":
    # Small, deterministic example shapes
    mic_input_dim = 128
    dis_input_dim = 96
    latent_dim = 32
    n_mic = 16
    n_dis = 12
    batch = 8
    tau = 1.0

    root = jax.random.PRNGKey(0)
    k_mic, k_dis, k_sm, k_data = jax.random.split(root, 4)
    kd = jax.random.split(k_data, 6)

    mic_enc = make_encoder_params(k_mic, mic_input_dim, latent_dim)
    dis_enc = make_encoder_params(k_dis, dis_input_dim, latent_dim)
    smooth = make_smooth_params(k_sm, latent_dim)
    d_in_pad = _round_up(max(mic_input_dim, dis_input_dim), 128)
    stacked = stack_branch_params(mic_enc, dis_enc, smooth, d_in_pad)

    mic_feature = jax.random.normal(kd[0], (n_mic, mic_input_dim), jnp.float32)
    dis_feature = jax.random.normal(kd[1], (n_dis, dis_input_dim), jnp.float32)
    mic_i_feature = jax.random.normal(kd[2], (batch, mic_input_dim), jnp.float32)
    mic_i_hat_feature = jax.random.normal(kd[3], (batch, mic_input_dim), jnp.float32)
    disease_j_feature = jax.random.normal(kd[4], (batch, dis_input_dim), jnp.float32)
    disease_j_hat_feature = jax.random.normal(kd[5], (batch, dis_input_dim), jnp.float32)

    fwd = jax.jit(micro_disease_forward)
    norm_sim, loss = fwd(
        mic_feature,
        dis_feature,
        mic_i_feature,
        mic_i_hat_feature,
        disease_j_feature,
        disease_j_hat_feature,
        jnp.float32(tau),   # traced SMEM scalar: no recompile per tau value
        stacked,
    )
    jax.block_until_ready((norm_sim, loss))

    assert norm_sim.shape == (n_mic, n_dis)
    assert norm_sim.dtype == jnp.float32
    assert loss.shape == ()
    assert bool(jnp.isfinite(loss))
    assert bool(jnp.all(jnp.isfinite(norm_sim)))
    print("KERNEL_OK")
</pallas_src>

<mosaic_0001>
module attributes {stable_mosaic.version = 11 : i64} {
  func.func @fused_kernel(%arg0: i32, %arg1: memref<1x1xf32, #tpu.memory_space<smem>>, %arg2: memref<1x32x128xbf16, #tpu.memory_space<vmem>>, %arg3: memref<1x128x512xbf16, #tpu.memory_space<vmem>>, %arg4: memref<1x1x512xf32, #tpu.memory_space<vmem>>, %arg5: memref<1x512x256xbf16, #tpu.memory_space<vmem>>, %arg6: memref<1x1x256xf32, #tpu.memory_space<vmem>>, %arg7: memref<1x256x64xbf16, #tpu.memory_space<vmem>>, %arg8: memref<1x1x64xf32, #tpu.memory_space<vmem>>, %arg9: memref<1x64x32xbf16, #tpu.memory_space<vmem>>, %arg10: memref<1x1x32xf32, #tpu.memory_space<vmem>>, %arg11: memref<1x32x32xbf16, #tpu.memory_space<vmem>>, %arg12: memref<1x1x32xf32, #tpu.memory_space<vmem>>, %arg13: memref<1x32x32xbf16, #tpu.memory_space<vmem>>, %arg14: memref<1x1x32xf32, #tpu.memory_space<vmem>>, %arg15: memref<1x32x32xbf16, #tpu.memory_space<vmem>>, %arg16: memref<1x1x32xf32, #tpu.memory_space<vmem>>, %arg17: memref<1x32x32xbf16, #tpu.memory_space<vmem>>, %arg18: memref<1x1x32xf32, #tpu.memory_space<vmem>>, %arg19: memref<1x32x32xbf16, #tpu.memory_space<vmem>>, %arg20: memref<1x1x32xf32, #tpu.memory_space<vmem>>, %arg21: memref<1x32x32xbf16, #tpu.memory_space<vmem>>, %arg22: memref<1x1x32xf32, #tpu.memory_space<vmem>>, %arg23: memref<16x12xf32, #tpu.memory_space<vmem>>, %arg24: memref<1x1xf32, #tpu.memory_space<vmem>>, %arg25: memref<32x32xf32, #tpu.memory_space<vmem>>) attributes {dimension_semantics = [#tpu.dimension_semantics<arbitrary>], iteration_bounds = array<i64: 2>, scalar_prefetch = 0 : i64, scratch_operands = 1 : i64, tpu.core_type = #tpu.core_type<tc>, window_params = [{transform_indices = @transform_0, window_bounds = array<i64: 1, 1>}, {transform_indices = @transform_1, window_bounds = array<i64: 1, 32, 128>}, {transform_indices = @transform_2, window_bounds = array<i64: 1, 128, 512>}, {transform_indices = @transform_3, window_bounds = array<i64: 1, 1, 512>}, {transform_indices = @transform_4, window_bounds = array<i64: 1, 512, 256>}, {transform_indices = @transform_5, window_bounds = array<i64: 1, 1, 256>}, {transform_indices = @transform_6, window_bounds = array<i64: 1, 256, 64>}, {transform_indices = @transform_7, window_bounds = array<i64: 1, 1, 64>}, {transform_indices = @transform_8, window_bounds = array<i64: 1, 64, 32>}, {transform_indices = @transform_9, window_bounds = array<i64: 1, 1, 32>}, {transform_indices = @transform_10, window_bounds = array<i64: 1, 32, 32>}, {transform_indices = @transform_11, window_bounds = array<i64: 1, 1, 32>}, {transform_indices = @transform_12, window_bounds = array<i64: 1, 32, 32>}, {transform_indices = @transform_13, window_bounds = array<i64: 1, 1, 32>}, {transform_indices = @transform_14, window_bounds = array<i64: 1, 32, 32>}, {transform_indices = @transform_15, window_bounds = array<i64: 1, 1, 32>}, {transform_indices = @transform_16, window_bounds = array<i64: 1, 32, 32>}, {transform_indices = @transform_17, window_bounds = array<i64: 1, 1, 32>}, {transform_indices = @transform_18, window_bounds = array<i64: 1, 32, 32>}, {transform_indices = @transform_19, window_bounds = array<i64: 1, 1, 32>}, {transform_indices = @transform_20, window_bounds = array<i64: 1, 32, 32>}, {transform_indices = @transform_21, window_bounds = array<i64: 1, 1, 32>}, {pipeline_mode = #tpu.pipeline_mode<synchronous>, transform_indices = @transform_22, window_bounds = array<i64: 16, 12>}, {pipeline_mode = #tpu.pipeline_mode<synchronous>, transform_indices = @transform_23, window_bounds = array<i64: 1, 1>}]} {
    %c0 = arith.constant 0 : index
    %c0_0 = arith.constant 0 : index
    %c0_1 = arith.constant 0 : index
    %0 = vector.load %arg2[%c0, %c0_0, %c0_1] : memref<1x32x128xbf16, #tpu.memory_space<vmem>>, vector<1x32x128xbf16>
    %1 = vector.shape_cast %0 : vector<1x32x128xbf16> to vector<32x128xbf16>
    %c0_2 = arith.constant 0 : index
    %c0_3 = arith.constant 0 : index
    %c0_4 = arith.constant 0 : index
    %2 = vector.load %arg3[%c0_2, %c0_3, %c0_4] : memref<1x128x512xbf16, #tpu.memory_space<vmem>>, vector<1x128x512xbf16>
    %3 = vector.shape_cast %2 : vector<1x128x512xbf16> to vector<128x512xbf16>
    %cst = arith.constant dense<0.000000e+00> : vector<32x512xf32>
    %4 = tpu.matmul %1, %3, %cst {dimension_numbers = #tpu.dot_dimension_numbers<[1], [0], [0], [1], [0, 0, 1, 1], [], []>} : vector<32x128xbf16>, vector<128x512xbf16>, vector<32x512xf32> -> vector<32x512xf32>
    %c0_5 = arith.constant 0 : index
    %c0_6 = arith.constant 0 : index
    %c0_7 = arith.constant 0 : index
    %5 = vector.load %arg4[%c0_5, %c0_6, %c0_7] : memref<1x1x512xf32, #tpu.memory_space<vmem>>, vector<1x1x512xf32>
    %6 = vector.shape_cast %5 : vector<1x1x512xf32> to vector<1x512xf32>
    %7 = vector.broadcast %6 : vector<1x512xf32> to vector<32x512xf32>
    %8 = arith.addf %4, %7 : vector<32x512xf32>
    %cst_8 = arith.constant 0.000000e+00 : f32
    %9 = vector.broadcast %cst_8 : f32 to vector<32x512xf32>
    %10 = arith.maximumf %8, %9 : vector<32x512xf32>
    %11 = arith.truncf %10 : vector<32x512xf32> to vector<32x512xbf16>
    %c0_9 = arith.constant 0 : index
    %c0_10 = arith.constant 0 : index
    %c0_11 = arith.constant 0 : index
    %12 = vector.load %arg5[%c0_9, %c0_10, %c0_11] : memref<1x512x256xbf16, #tpu.memory_space<vmem>>, vector<1x512x256xbf16>
    %13 = vector.shape_cast %12 : vector<1x512x256xbf16> to vector<512x256xbf16>
    %cst_12 = arith.constant dense<0.000000e+00> : vector<32x256xf32>
    %14 = tpu.matmul %11, %13, %cst_12 {dimension_numbers = #tpu.dot_dimension_numbers<[1], [0], [0], [1], [0, 0, 1, 1], [], []>} : vector<32x512xbf16>, vector<512x256xbf16>, vector<32x256xf32> -> vector<32x256xf32>
    %c0_13 = arith.constant 0 : index
    %c0_14 = arith.constant 0 : index
    %c0_15 = arith.constant 0 : index
    %15 = vector.load %arg6[%c0_13, %c0_14, %c0_15] : memref<1x1x256xf32, #tpu.memory_space<vmem>>, vector<1x1x256xf32>
    %16 = vector.shape_cast %15 : vector<1x1x256xf32> to vector<1x256xf32>
    %17 = vector.broadcast %16 : vector<1x256xf32> to vector<32x256xf32>
    %18 = arith.addf %14, %17 : vector<32x256xf32>
    %cst_16 = arith.constant 0.000000e+00 : f32
    %19 = vector.broadcast %cst_16 : f32 to vector<32x256xf32>
    %20 = arith.maximumf %18, %19 : vector<32x256xf32>
    %21 = arith.truncf %20 : vector<32x256xf32> to vector<32x256xbf16>
    %c0_17 = arith.constant 0 : index
    %c0_18 = arith.constant 0 : index
    %c0_19 = arith.constant 0 : index
    %22 = vector.load %arg7[%c0_17, %c0_18, %c0_19] : memref<1x256x64xbf16, #tpu.memory_space<vmem>>, vector<1x256x64xbf16>
    %23 = vector.shape_cast %22 : vector<1x256x64xbf16> to vector<256x64xbf16>
    %cst_20 = arith.constant dense<0.000000e+00> : vector<32x64xf32>
    %24 = tpu.matmul %21, %23, %cst_20 {dimension_numbers = #tpu.dot_dimension_numbers<[1], [0], [0], [1], [0, 0, 1, 1], [], []>} : vector<32x256xbf16>, vector<256x64xbf16>, vector<32x64xf32> -> vector<32x64xf32>
    %c0_21 = arith.constant 0 : index
    %c0_22 = arith.constant 0 : index
    %c0_23 = arith.constant 0 : index
    %25 = vector.load %arg8[%c0_21, %c0_22, %c0_23] : memref<1x1x64xf32, #tpu.memory_space<vmem>>, vector<1x1x64xf32>
    %26 = vector.shape_cast %25 : vector<1x1x64xf32> to vector<1x64xf32>
    %27 = vector.broadcast %26 : vector<1x64xf32> to vector<32x64xf32>
    %28 = arith.addf %24, %27 : vector<32x64xf32>
    %cst_24 = arith.constant 0.000000e+00 : f32
    %29 = vector.broadcast %cst_24 : f32 to vector<32x64xf32>
    %30 = arith.maximumf %28, %29 : vector<32x64xf32>
    %31 = arith.truncf %30 : vector<32x64xf32> to vector<32x64xbf16>
    %c0_25 = arith.constant 0 : index
    %c0_26 = arith.constant 0 : index
    %c0_27 = arith.constant 0 : index
    %32 = vector.load %arg9[%c0_25, %c0_26, %c0_27] : memref<1x64x32xbf16, #tpu.memory_space<vmem>>, vector<1x64x32xbf16>
    %33 = vector.shape_cast %32 : vector<1x64x32xbf16> to vector<64x32xbf16>
    %cst_28 = arith.constant dense<0.000000e+00> : vector<32x32xf32>
    %34 = tpu.matmul %31, %33, %cst_28 {dimension_numbers = #tpu.dot_dimension_numbers<[1], [0], [0], [1], [0, 0, 1, 1], [], []>} : vector<32x64xbf16>, vector<64x32xbf16>, vector<32x32xf32> -> vector<32x32xf32>
    %c0_29 = arith.constant 0 : index
    %c0_30 = arith.constant 0 : index
    %c0_31 = arith.constant 0 : index
    %35 = vector.load %arg10[%c0_29, %c0_30, %c0_31] : memref<1x1x32xf32, #tpu.memory_space<vmem>>, vector<1x1x32xf32>
    %36 = vector.shape_cast %35 : vector<1x1x32xf32> to vector<1x32xf32>
    %37 = vector.broadcast %36 : vector<1x32xf32> to vector<32x32xf32>
    %38 = arith.addf %34, %37 : vector<32x32xf32>
    %39 = arith.truncf %38 : vector<32x32xf32> to vector<32x32xbf16>
    %c0_32 = arith.constant 0 : index
    %c0_33 = arith.constant 0 : index
    %c0_34 = arith.constant 0 : index
    %40 = vector.load %arg11[%c0_32, %c0_33, %c0_34] : memref<1x32x32xbf16, #tpu.memory_space<vmem>>, vector<1x32x32xbf16>
    %41 = vector.shape_cast %40 : vector<1x32x32xbf16> to vector<32x32xbf16>
    %cst_35 = arith.constant dense<0.000000e+00> : vector<32x32xf32>
    %42 = tpu.matmul %39, %41, %cst_35 {dimension_numbers = #tpu.dot_dimension_numbers<[1], [0], [0], [1], [0, 0, 1, 1], [], []>} : vector<32x32xbf16>, vector<32x32xbf16>, vector<32x32xf32> -> vector<32x32xf32>
    %c0_36 = arith.constant 0 : index
    %c0_37 = arith.constant 0 : index
    %c0_38 = arith.constant 0 : index
    %43 = vector.load %arg12[%c0_36, %c0_37, %c0_38] : memref<1x1x32xf32, #tpu.memory_space<vmem>>, vector<1x1x32xf32>
    %44 = vector.shape_cast %43 : vector<1x1x32xf32> to vector<1x32xf32>
    %45 = vector.broadcast %44 : vector<1x32xf32> to vector<32x32xf32>
    %46 = arith.addf %42, %45 : vector<32x32xf32>
    %cst_39 = arith.constant 0.000000e+00 : f32
    %47 = vector.broadcast %cst_39 : f32 to vector<32x32xf32>
    %48 = arith.maximumf %46, %47 : vector<32x32xf32>
    %49 = arith.truncf %48 : vector<32x32xf32> to vector<32x32xbf16>
    %c0_40 = arith.constant 0 : index
    %c0_41 = arith.constant 0 : index
    %c0_42 = arith.constant 0 : index
    %50 = vector.load %arg13[%c0_40, %c0_41, %c0_42] : memref<1x32x32xbf16, #tpu.memory_space<vmem>>, vector<1x32x32xbf16>
    %51 = vector.shape_cast %50 : vector<1x32x32xbf16> to vector<32x32xbf16>
    %cst_43 = arith.constant dense<0.000000e+00> : vector<32x32xf32>
    %52 = tpu.matmul %49, %51, %cst_43 {dimension_numbers = #tpu.dot_dimension_numbers<[1], [0], [0], [1], [0, 0, 1, 1], [], []>} : vector<32x32xbf16>, vector<32x32xbf16>, vector<32x32xf32> -> vector<32x32xf32>
    %c0_44 = arith.constant 0 : index
    %c0_45 = arith.constant 0 : index
    %c0_46 = arith.constant 0 : index
    %53 = vector.load %arg14[%c0_44, %c0_45, %c0_46] : memref<1x1x32xf32, #tpu.memory_space<vmem>>, vector<1x1x32xf32>
    %54 = vector.shape_cast %53 : vector<1x1x32xf32> to vector<1x32xf32>
    %55 = vector.broadcast %54 : vector<1x32xf32> to vector<32x32xf32>
    %56 = arith.addf %52, %55 : vector<32x32xf32>
    %57 = arith.addf %38, %56 : vector<32x32xf32>
    %58 = arith.truncf %57 : vector<32x32xf32> to vector<32x32xbf16>
    %c0_47 = arith.constant 0 : index
    %c0_48 = arith.constant 0 : index
    %c0_49 = arith.constant 0 : index
    %59 = vector.load %arg15[%c0_47, %c0_48, %c0_49] : memref<1x32x32xbf16, #tpu.memory_space<vmem>>, vector<1x32x32xbf16>
    %60 = vector.shape_cast %59 : vector<1x32x32xbf16> to vector<32x32xbf16>
    %cst_50 = arith.constant dense<0.000000e+00> : vector<32x32xf32>
    %61 = tpu.matmul %58, %60, %cst_50 {dimension_numbers = #tpu.dot_dimension_numbers<[1], [0], [0], [1], [0, 0, 1, 1], [], []>} : vector<32x32xbf16>, vector<32x32xbf16>, vector<32x32xf32> -> vector<32x32xf32>
    %c0_51 = arith.constant 0 : index
    %c0_52 = arith.constant 0 : index
    %c0_53 = arith.constant 0 : index
    %62 = vector.load %arg16[%c0_51, %c0_52, %c0_53] : memref<1x1x32xf32, #tpu.memory_space<vmem>>, vector<1x1x32xf32>
    %63 = vector.shape_cast %62 : vector<1x1x32xf32> to vector<1x32xf32>
    %64 = vector.broadcast %63 : vector<1x32xf32> to vector<32x32xf32>
    %65 = arith.addf %61, %64 : vector<32x32xf32>
    %cst_54 = arith.constant 0.000000e+00 : f32
    %66 = vector.broadcast %cst_54 : f32 to vector<32x32xf32>
    %67 = arith.maximumf %65, %66 : vector<32x32xf32>
    %68 = arith.truncf %67 : vector<32x32xf32> to vector<32x32xbf16>
    %c0_55 = arith.constant 0 : index
    %c0_56 = arith.constant 0 : index
    %c0_57 = arith.constant 0 : index
    %69 = vector.load %arg17[%c0_55, %c0_56, %c0_57] : memref<1x32x32xbf16, #tpu.memory_space<vmem>>, vector<1x32x32xbf16>
    %70 = vector.shape_cast %69 : vector<1x32x32xbf16> to vector<32x32xbf16>
    %cst_58 = arith.constant dense<0.000000e+00> : vector<32x32xf32>
    %71 = tpu.matmul %68, %70, %cst_58 {dimension_numbers = #tpu.dot_dimension_numbers<[1], [0], [0], [1], [0, 0, 1, 1], [], []>} : vector<32x32xbf16>, vector<32x32xbf16>, vector<32x32xf32> -> vector<32x32xf32>
    %c0_59 = arith.constant 0 : index
    %c0_60 = arith.constant 0 : index
    %c0_61 = arith.constant 0 : index
    %72 = vector.load %arg18[%c0_59, %c0_60, %c0_61] : memref<1x1x32xf32, #tpu.memory_space<vmem>>, vector<1x1x32xf32>
    %73 = vector.shape_cast %72 : vector<1x1x32xf32> to vector<1x32xf32>
    %74 = vector.broadcast %73 : vector<1x32xf32> to vector<32x32xf32>
    %75 = arith.addf %71, %74 : vector<32x32xf32>
    %76 = arith.addf %57, %75 : vector<32x32xf32>
    %77 = arith.truncf %76 : vector<32x32xf32> to vector<32x32xbf16>
    %c0_62 = arith.constant 0 : index
    %c0_63 = arith.constant 0 : index
    %c0_64 = arith.constant 0 : index
    %78 = vector.load %arg19[%c0_62, %c0_63, %c0_64] : memref<1x32x32xbf16, #tpu.memory_space<vmem>>, vector<1x32x32xbf16>
    %79 = vector.shape_cast %78 : vector<1x32x32xbf16> to vector<32x32xbf16>
    %cst_65 = arith.constant dense<0.000000e+00> : vector<32x32xf32>
    %80 = tpu.matmul %77, %79, %cst_65 {dimension_numbers = #tpu.dot_dimension_numbers<[1], [0], [0], [1], [0, 0, 1, 1], [], []>} : vector<32x32xbf16>, vector<32x32xbf16>, vector<32x32xf32> -> vector<32x32xf32>
    %c0_66 = arith.constant 0 : index
    %c0_67 = arith.constant 0 : index
    %c0_68 = arith.constant 0 : index
    %81 = vector.load %arg20[%c0_66, %c0_67, %c0_68] : memref<1x1x32xf32, #tpu.memory_space<vmem>>, vector<1x1x32xf32>
    %82 = vector.shape_cast %81 : vector<1x1x32xf32> to vector<1x32xf32>
    %83 = vector.broadcast %82 : vector<1x32xf32> to vector<32x32xf32>
    %84 = arith.addf %80, %83 : vector<32x32xf32>
    %cst_69 = arith.constant 0.000000e+00 : f32
    %85 = vector.broadcast %cst_69 : f32 to vector<32x32xf32>
    %86 = arith.maximumf %84, %85 : vector<32x32xf32>
    %87 = arith.truncf %86 : vector<32x32xf32> to vector<32x32xbf16>
    %c0_70 = arith.constant 0 : index
    %c0_71 = arith.constant 0 : index
    %c0_72 = arith.constant 0 : index
    %88 = vector.load %arg21[%c0_70, %c0_71, %c0_72] : memref<1x32x32xbf16, #tpu.memory_space<vmem>>, vector<1x32x32xbf16>
    %89 = vector.shape_cast %88 : vector<1x32x32xbf16> to vector<32x32xbf16>
    %cst_73 = arith.constant dense<0.000000e+00> : vector<32x32xf32>
    %90 = tpu.matmul %87, %89, %cst_73 {dimension_numbers = #tpu.dot_dimension_numbers<[1], [0], [0], [1], [0, 0, 1, 1], [], []>} : vector<32x32xbf16>, vector<32x32xbf16>, vector<32x32xf32> -> vector<32x32xf32>
    %c0_74 = arith.constant 0 : index
    %c0_75 = arith.constant 0 : index
    %c0_76 = arith.constant 0 : index
    %91 = vector.load %arg22[%c0_74, %c0_75, %c0_76] : memref<1x1x32xf32, #tpu.memory_space<vmem>>, vector<1x1x32xf32>
    %92 = vector.shape_cast %91 : vector<1x1x32xf32> to vector<1x32xf32>
    %93 = vector.broadcast %92 : vector<1x32xf32> to vector<32x32xf32>
    %94 = arith.addf %90, %93 : vector<32x32xf32>
    %95 = arith.addf %76, %94 : vector<32x32xf32>
    %c0_i32 = arith.constant 0 : i32
    %96 = arith.cmpi eq, %arg0, %c0_i32 : i32
    %97 = arith.extui %96 : i1 to i32
    %c0_i32_77 = arith.constant 0 : i32
    %98 = arith.cmpi ne, %97, %c0_i32_77 : i32
    scf.if %98 {
      %c0_79 = arith.constant 0 : index
      %c0_80 = arith.constant 0 : index
      %102 = vector.load %arg25[%c0_79, %c0_80] : memref<32x32xf32, #tpu.memory_space<vmem>>, vector<32x32xf32>
      tpu.vector_store %arg25[%c0_79, %c0_80], %95 {strides = array<i32>} : memref<32x32xf32, #tpu.memory_space<vmem>>, vector<32x32xf32>,
      %cst_81 = arith.constant 0.000000e+00 : f32
      %103 = vector.broadcast %cst_81 : f32 to vector<16x12xf32>
      %c0_82 = arith.constant 0 : index
      %c0_83 = arith.constant 0 : index
      %104 = vector.load %arg23[%c0_82, %c0_83] : memref<16x12xf32, #tpu.memory_space<vmem>>, vector<16x12xf32>
      tpu.vector_store %arg23[%c0_82, %c0_83], %103 {strides = array<i32>} : memref<16x12xf32, #tpu.memory_space<vmem>>, vector<16x12xf32>,
      %cst_84 = arith.constant 0.000000e+00 : f32
      %105 = vector.broadcast %cst_84 : f32 to vector<1x1xf32>
      %c0_85 = arith.constant 0 : index
      %c0_86 = arith.constant 0 : index
      %106 = vector.load %arg24[%c0_85, %c0_86] : memref<1x1xf32, #tpu.memory_space<vmem>>, vector<1x1xf32>
      tpu.vector_store %arg24[%c0_85, %c0_86], %105 {strides = array<i32>} : memref<1x1xf32, #tpu.memory_space<vmem>>, vector<1x1xf32>,
    } else {
    }
    %c1_i32 = arith.constant 1 : i32
    %99 = arith.cmpi eq, %arg0, %c1_i32 : i32
    %100 = arith.extui %99 : i1 to i32
    %c0_i32_78 = arith.constant 0 : i32
    %101 = arith.cmpi ne, %100, %c0_i32_78 : i32
    scf.if %101 {
      %c0_79 = arith.constant 0 : index
      %c0_80 = arith.constant 0 : index
      %102 = vector.load %arg25[%c0_79, %c0_80] : memref<32x32xf32, #tpu.memory_space<vmem>>, vector<32x32xf32>
      %103 = vector.extract_strided_slice %102 {offsets = [0, 0], sizes = [16, 32], strides = [1, 1]} : vector<32x32xf32> to vector<16x32xf32>
      %104 = vector.extract_strided_slice %102 {offsets = [16, 0], sizes = [8, 32], strides = [1, 1]} : vector<32x32xf32> to vector<8x32xf32>
      %105 = vector.extract_strided_slice %102 {offsets = [24, 0], sizes = [8, 32], strides = [1, 1]} : vector<32x32xf32> to vector<8x32xf32>
      %106 = vector.extract_strided_slice %95 {offsets = [0, 0], sizes = [12, 32], strides = [1, 1]} : vector<32x32xf32> to vector<12x32xf32>
      %107 = vector.extract_strided_slice %95 {offsets = [16, 0], sizes = [8, 32], strides = [1, 1]} : vector<32x32xf32> to vector<8x32xf32>
      %108 = vector.extract_strided_slice %95 {offsets = [24, 0], sizes = [8, 32], strides = [1, 1]} : vector<32x32xf32> to vector<8x32xf32>
      %cst_81 = arith.constant dense<0.000000e+00> : vector<16x12xf32>
      %109 = tpu.matmul %103, %106, %cst_81 {dimension_numbers = #tpu.dot_dimension_numbers<[1], [1], [0], [0], [0, 0, 1, 0], [], []>} : vector<16x32xf32>, vector<12x32xf32>, vector<16x12xf32> -> vector<16x12xf32>
      %110 = vector.shape_cast %109 : vector<16x12xf32> to vector<1x16x12xf32>
      %cst_82 = arith.constant dense<0x7F800000> : vector<1xf32>
      %111 = vector.multi_reduction <minimumf>, %110, %cst_82 [1, 2] : vector<1x16x12xf32> to vector<1xf32>
      %112 = vector.shape_cast %111 : vector<1xf32> to vector<1x1x1xf32>
      %113 = vector.extract %112[0, 0, 0] : f32 from vector<1x1x1xf32>
      %114 = vector.broadcast %113 : f32 to vector<1x1xf32>
      %115 = vector.shape_cast %109 : vector<16x12xf32> to vector<1x16x12xf32>
      %cst_83 = arith.constant dense<0xFF800000> : vector<1xf32>
      %116 = vector.multi_reduction <maximumf>, %115, %cst_83 [1, 2] : vector<1x16x12xf32> to vector<1xf32>
      %117 = vector.shape_cast %116 : vector<1xf32> to vector<1x1x1xf32>
      %118 = vector.extract %117[0, 0, 0] : f32 from vector<1x1x1xf32>
      %119 = vector.broadcast %118 : f32 to vector<1x1xf32>
      %120 = vector.broadcast %114 : vector<1x1xf32> to vector<16x12xf32>
      %121 = arith.subf %109, %120 : vector<16x12xf32>
      %122 = arith.subf %119, %114 : vector<1x1xf32>
      %123 = vector.broadcast %122 : vector<1x1xf32> to vector<16x12xf32>
      %124 = arith.divf %121, %123 : vector<16x12xf32>
      %c0_84 = arith.constant 0 : index
      %c0_85 = arith.constant 0 : index
      %125 = vector.load %arg23[%c0_84, %c0_85] : memref<16x12xf32, #tpu.memory_space<vmem>>, vector<16x12xf32>
      tpu.vector_store %arg23[%c0_84, %c0_85], %124 {strides = array<i32>} : memref<16x12xf32, #tpu.memory_space<vmem>>, vector<16x12xf32>,
      %126 = arith.mulf %104, %104 : vector<8x32xf32>
      %cst_86 = arith.constant dense<0.000000e+00> : vector<8xf32>
      %127 = vector.multi_reduction <add>, %126, %cst_86 [1] : vector<8x32xf32> to vector<8xf32>
      %128 = vector.shape_cast %127 : vector<8xf32> to vector<8x1xf32>
      %129 = math.sqrt %128 : vector<8x1xf32>
      %cst_87 = arith.constant 9.99999996E-13 : f32
      %130 = vector.broadcast %cst_87 : f32 to vector<8x1xf32>
      %131 = arith.maximumf %129, %130 : vector<8x1xf32>
      %132 = vector.broadcast %131 : vector<8x1xf32> to vector<8x32xf32>
      %133 = arith.divf %104, %132 : vector<8x32xf32>
      %134 = arith.mulf %105, %105 : vector<8x32xf32>
      %cst_88 = arith.constant dense<0.000000e+00> : vector<8xf32>
      %135 = vector.multi_reduction <add>, %134, %cst_88 [1] : vector<8x32xf32> to vector<8xf32>
      %136 = vector.shape_cast %135 : vector<8xf32> to vector<8x1xf32>
      %137 = math.sqrt %136 : vector<8x1xf32>
      %cst_89 = arith.constant 9.99999996E-13 : f32
      %138 = vector.broadcast %cst_89 : f32 to vector<8x1xf32>
      %139 = arith.maximumf %137, %138 : vector<8x1xf32>
      %140 = vector.broadcast %139 : vector<8x1xf32> to vector<8x32xf32>
      %141 = arith.divf %105, %140 : vector<8x32xf32>
      %142 = arith.mulf %107, %107 : vector<8x32xf32>
      %cst_90 = arith.constant dense<0.000000e+00> : vector<8xf32>
      %143 = vector.multi_reduction <add>, %142, %cst_90 [1] : vector<8x32xf32> to vector<8xf32>
      %144 = vector.shape_cast %143 : vector<8xf32> to vector<8x1xf32>
      %145 = math.sqrt %144 : vector<8x1xf32>
      %cst_91 = arith.constant 9.99999996E-13 : f32
      %146 = vector.broadcast %cst_91 : f32 to vector<8x1xf32>
      %147 = arith.maximumf %145, %146 : vector<8x1xf32>
      %148 = vector.broadcast %147 : vector<8x1xf32> to vector<8x32xf32>
      %149 = arith.divf %107, %148 : vector<8x32xf32>
      %150 = arith.mulf %108, %108 : vector<8x32xf32>
      %cst_92 = arith.constant dense<0.000000e+00> : vector<8xf32>
      %151 = vector.multi_reduction <add>, %150, %cst_92 [1] : vector<8x32xf32> to vector<8xf32>
      %152 = vector.shape_cast %151 : vector<8xf32> to vector<8x1xf32>
      %153 = math.sqrt %152 : vector<8x1xf32>
      %cst_93 = arith.constant 9.99999996E-13 : f32
      %154 = vector.broadcast %cst_93 : f32 to vector<8x1xf32>
      %155 = arith.maximumf %153, %154 : vector<8x1xf32>
      %156 = vector.broadcast %155 : vector<8x1xf32> to vector<8x32xf32>
      %157 = arith.divf %108, %156 : vector<8x32xf32>
      %c0_94 = arith.constant 0 : index
      %c0_95 = arith.constant 0 : index
      %158 = memref.load %arg1[%c0_94, %c0_95] : memref<1x1xf32, #tpu.memory_space<smem>>
      %cst_96 = arith.constant 1.000000e+00 : f32
      %159 = arith.divf %cst_96, %158 : f32
      %160 = arith.mulf %133, %149 : vector<8x32xf32>
      %cst_97 = arith.constant dense<0.000000e+00> : vector<8xf32>
      %161 = vector.multi_reduction <add>, %160, %cst_97 [1] : vector<8x32xf32> to vector<8xf32>
      %162 = vector.shape_cast %161 : vector<8xf32> to vector<8x1xf32>
      %163 = vector.broadcast %159 : f32 to vector<8x1xf32>
      %164 = arith.mulf %162, %163 : vector<8x1xf32>
      %165 = arith.mulf %133, %157 : vector<8x32xf32>
      %cst_98 = arith.constant dense<0.000000e+00> : vector<8xf32>
      %166 = vector.multi_reduction <add>, %165, %cst_98 [1] : vector<8x32xf32> to vector<8xf32>
      %167 = vector.shape_cast %166 : vector<8xf32> to vector<8x1xf32>
      %168 = vector.broadcast %159 : f32 to vector<8x1xf32>
      %169 = arith.mulf %167, %168 : vector<8x1xf32>
      %170 = arith.mulf %141, %149 : vector<8x32xf32>
      %cst_99 = arith.constant dense<0.000000e+00> : vector<8xf32>
      %171 = vector.multi_reduction <add>, %170, %cst_99 [1] : vector<8x32xf32> to vector<8xf32>
      %172 = vector.shape_cast %171 : vector<8xf32> to vector<8x1xf32>
      %173 = vector.broadcast %159 : f32 to vector<8x1xf32>
      %174 = arith.mulf %172, %173 : vector<8x1xf32>
      %175 = arith.maximumf %164, %169 : vector<8x1xf32>
      %176 = arith.maximumf %175, %174 : vector<8x1xf32>
      %177 = arith.subf %164, %176 : vector<8x1xf32>
      %178 = math.exp %177 : vector<8x1xf32>
      %179 = arith.subf %169, %176 : vector<8x1xf32>
      %180 = math.exp %179 : vector<8x1xf32>
      %181 = arith.addf %178, %180 : vector<8x1xf32>
      %182 = arith.subf %174, %176 : vector<8x1xf32>
      %183 = math.exp %182 : vector<8x1xf32>
      %184 = arith.addf %181, %183 : vector<8x1xf32>
      %185 = math.log %184 : vector<8x1xf32>
      %186 = arith.addf %176, %185 : vector<8x1xf32>
      %187 = arith.subf %186, %164 : vector<8x1xf32>
      %188 = vector.shape_cast %187 : vector<8x1xf32> to vector<1x8x1xf32>
      %cst_100 = arith.constant dense<0.000000e+00> : vector<1xf32>
      %189 = vector.multi_reduction <add>, %188, %cst_100 [1, 2] : vector<1x8x1xf32> to vector<1xf32>
      %190 = vector.shape_cast %189 : vector<1xf32> to vector<1x1x1xf32>
      %191 = vector.extract %190[0, 0, 0] : f32 from vector<1x1x1xf32>
      %192 = vector.broadcast %191 : f32 to vector<1x1xf32>
      %cst_101 = arith.constant 8.000000e+00 : f32
      %193 = vector.broadcast %cst_101 : f32 to vector<1x1xf32>
      %194 = arith.divf %192, %193 : vector<1x1xf32>
      %c0_102 = arith.constant 0 : index
      %c0_103 = arith.constant 0 : index
      %195 = vector.load %arg24[%c0_102, %c0_103] : memref<1x1xf32, #tpu.memory_space<vmem>>, vector<1x1xf32>
      tpu.vector_store %arg24[%c0_102, %c0_103], %194 {strides = array<i32>} : memref<1x1xf32, #tpu.memory_space<vmem>>, vector<1x1xf32>,
    } else {
    }
    return
  }
  func.func @transform_0(%arg0: i32) -> (i32, i32) {
    %c0_i32 = arith.constant 0 : i32
    %c0_i32_0 = arith.constant 0 : i32
    %c0_i32_1 = arith.constant 0 : i32
    return %c0_i32, %c0_i32_0 : i32, i32
  }
  func.func @transform_1(%arg0: i32) -> (i32, i32, i32) {
    %c0_i32 = arith.constant 0 : i32
    %c0_i32_0 = arith.constant 0 : i32
    %c0_i32_1 = arith.constant 0 : i32
    return %arg0, %c0_i32, %c0_i32_0 : i32, i32, i32
  }
  func.func @transform_2(%arg0: i32) -> (i32, i32, i32) {
    %c0_i32 = arith.constant 0 : i32
    %c0_i32_0 = arith.constant 0 : i32
    %c0_i32_1 = arith.constant 0 : i32
    return %arg0, %c0_i32, %c0_i32_0 : i32, i32, i32
  }
  func.func @transform_3(%arg0: i32) -> (i32, i32, i32) {
    %c0_i32 = arith.constant 0 : i32
    %c0_i32_0 = arith.constant 0 : i32
    %c0_i32_1 = arith.constant 0 : i32
    return %arg0, %c0_i32, %c0_i32_0 : i32, i32, i32
  }
  func.func @transform_4(%arg0: i32) -> (i32, i32, i32) {
    %c0_i32 = arith.constant 0 : i32
    %c0_i32_0 = arith.constant 0 : i32
    %c0_i32_1 = arith.constant 0 : i32
    return %arg0, %c0_i32, %c0_i32_0 : i32, i32, i32
  }
  func.func @transform_5(%arg0: i32) -> (i32, i32, i32) {
    %c0_i32 = arith.constant 0 : i32
    %c0_i32_0 = arith.constant 0 : i32
    %c0_i32_1 = arith.constant 0 : i32
    return %arg0, %c0_i32, %c0_i32_0 : i32, i32, i32
  }
  func.func @transform_6(%arg0: i32) -> (i32, i32, i32) {
    %c0_i32 = arith.constant 0 : i32
    %c0_i32_0 = arith.constant 0 : i32
    %c0_i32_1 = arith.constant 0 : i32
    return %arg0, %c0_i32, %c0_i32_0 : i32, i32, i32
  }
  func.func @transform_7(%arg0: i32) -> (i32, i32, i32) {
    %c0_i32 = arith.constant 0 : i32
    %c0_i32_0 = arith.constant 0 : i32
    %c0_i32_1 = arith.constant 0 : i32
    return %arg0, %c0_i32, %c0_i32_0 : i32, i32, i32
  }
  func.func @transform_8(%arg0: i32) -> (i32, i32, i32) {
    %c0_i32 = arith.constant 0 : i32
    %c0_i32_0 = arith.constant 0 : i32
    %c0_i32_1 = arith.constant 0 : i32
    return %arg0, %c0_i32, %c0_i32_0 : i32, i32, i32
  }
  func.func @transform_9(%arg0: i32) -> (i32, i32, i32) {
    %c0_i32 = arith.constant 0 : i32
    %c0_i32_0 = arith.constant 0 : i32
    %c0_i32_1 = arith.constant 0 : i32
    return %arg0, %c0_i32, %c0_i32_0 : i32, i32, i32
  }
  func.func @transform_10(%arg0: i32) -> (i32, i32, i32) {
    %c0_i32 = arith.constant 0 : i32
    %c0_i32_0 = arith.constant 0 : i32
    %c0_i32_1 = arith.constant 0 : i32
    return %arg0, %c0_i32, %c0_i32_0 : i32, i32, i32
  }
  func.func @transform_11(%arg0: i32) -> (i32, i32, i32) {
    %c0_i32 = arith.constant 0 : i32
    %c0_i32_0 = arith.constant 0 : i32
    %c0_i32_1 = arith.constant 0 : i32
    return %arg0, %c0_i32, %c0_i32_0 : i32, i32, i32
  }
  func.func @transform_12(%arg0: i32) -> (i32, i32, i32) {
    %c0_i32 = arith.constant 0 : i32
    %c0_i32_0 = arith.constant 0 : i32
    %c0_i32_1 = arith.constant 0 : i32
    return %arg0, %c0_i32, %c0_i32_0 : i32, i32, i32
  }
  func.func @transform_13(%arg0: i32) -> (i32, i32, i32) {
    %c0_i32 = arith.constant 0 : i32
    %c0_i32_0 = arith.constant 0 : i32
    %c0_i32_1 = arith.constant 0 : i32
    return %arg0, %c0_i32, %c0_i32_0 : i32, i32, i32
  }
  func.func @transform_14(%arg0: i32) -> (i32, i32, i32) {
    %c0_i32 = arith.constant 0 : i32
    %c0_i32_0 = arith.constant 0 : i32
    %c0_i32_1 = arith.constant 0 : i32
    return %arg0, %c0_i32, %c0_i32_0 : i32, i32, i32
  }
  func.func @transform_15(%arg0: i32) -> (i32, i32, i32) {
    %c0_i32 = arith.constant 0 : i32
    %c0_i32_0 = arith.constant 0 : i32
    %c0_i32_1 = arith.constant 0 : i32
    return %arg0, %c0_i32, %c0_i32_0 : i32, i32, i32
  }
  func.func @transform_16(%arg0: i32) -> (i32, i32, i32) {
    %c0_i32 = arith.constant 0 : i32
    %c0_i32_0 = arith.constant 0 : i32
    %c0_i32_1 = arith.constant 0 : i32
    return %arg0, %c0_i32, %c0_i32_0 : i32, i32, i32
  }
  func.func @transform_17(%arg0: i32) -> (i32, i32, i32) {
    %c0_i32 = arith.constant 0 : i32
    %c0_i32_0 = arith.constant 0 : i32
    %c0_i32_1 = arith.constant 0 : i32
    return %arg0, %c0_i32, %c0_i32_0 : i32, i32, i32
  }
  func.func @transform_18(%arg0: i32) -> (i32, i32, i32) {
    %c0_i32 = arith.constant 0 : i32
    %c0_i32_0 = arith.constant 0 : i32
    %c0_i32_1 = arith.constant 0 : i32
    return %arg0, %c0_i32, %c0_i32_0 : i32, i32, i32
  }
  func.func @transform_19(%arg0: i32) -> (i32, i32, i32) {
    %c0_i32 = arith.constant 0 : i32
    %c0_i32_0 = arith.constant 0 : i32
    %c0_i32_1 = arith.constant 0 : i32
    return %arg0, %c0_i32, %c0_i32_0 : i32, i32, i32
  }
  func.func @transform_20(%arg0: i32) -> (i32, i32, i32) {
    %c0_i32 = arith.constant 0 : i32
    %c0_i32_0 = arith.constant 0 : i32
    %c0_i32_1 = arith.constant 0 : i32
    return %arg0, %c0_i32, %c0_i32_0 : i32, i32, i32
  }
  func.func @transform_21(%arg0: i32) -> (i32, i32, i32) {
    %c0_i32 = arith.constant 0 : i32
    %c0_i32_0 = arith.constant 0 : i32
    %c0_i32_1 = arith.constant 0 : i32
    return %arg0, %c0_i32, %c0_i32_0 : i32, i32, i32
  }
  func.func @transform_22(%arg0: i32) -> (i32, i32) {
    %c0_i32 = arith.constant 0 : i32
    %c0_i32_0 = arith.constant 0 : i32
    %c0_i32_1 = arith.constant 0 : i32
    return %c0_i32, %c0_i32_0 : i32, i32
  }
  func.func @transform_23(%arg0: i32) -> (i32, i32) {
    %c0_i32 = arith.constant 0 : i32
    %c0_i32_0 = arith.constant 0 : i32
    %c0_i32_1 = arith.constant 0 : i32
    return %c0_i32, %c0_i32_0 : i32, i32
  }
}

</mosaic_0001>

<bundles_post_ra>
// kernel: micro_disease_forward.1
= control target key start
LH: loop header
LB: loop body
LE: loop exit
PB: predicated region body
PF: predicated region fallthrough
CT: control target
= control target key end

     0   :  { %s5511_s0 = inlined_call_operand.<no memory space> [shape: f32[1,1], index: 0, kind: input, shape index: {}]   ;;  %s5512_s1 = inlined_call_operand.vmem [shape: bf16[2,32,128], index: 1, kind: input, shape index: {}]   ;;  %s5513_s2 = inlined_call_operand.vmem [shape: bf16[2,128,512], index: 2, kind: input, shape index: {}]   ;;  %s5514_s3 = inlined_call_operand.hbm [shape: f32[2,1,512], index: 3, kind: input, shape index: {}]   ;;  %s5515_s4 = inlined_call_operand.hbm [shape: bf16[2,512,256], index: 4, kind: input, shape index: {}]   ;;  %s5516_s5 = inlined_call_operand.hbm [shape: f32[2,1,256], index: 5, kind: input, shape index: {}]   ;;  %s5517_s6 = inlined_call_operand.vmem [shape: bf16[2,256,64], index: 6, kind: input, shape index: {}]   ;;  %s5518_s7 = inlined_call_operand.hbm [shape: f32[2,1,64], index: 7, kind: input, shape index: {}]   ;;  %s5519_s8 = inlined_call_operand.vmem [shape: bf16[2,64,32], index: 8, kind: input, shape index: {}]   ;;  %s5520_s9 = inlined_call_operand.hbm [shape: f32[2,1,32], index: 9, kind: input, shape index: {}]   ;;  %s5521_s10 = inlined_call_operand.vmem [shape: bf16[2,32,32], index: 10, kind: input, shape index: {}]   ;;  %s5522_s11 = inlined_call_operand.hbm [shape: f32[2,1,32], index: 11, kind: input, shape index: {}]   ;;  %s5523_s12 = inlined_call_operand.vmem [shape: bf16[2,32,32], index: 12, kind: input, shape index: {}]   ;;  %s5524_s13 = inlined_call_operand.vmem [shape: f32[2,1,32], index: 13, kind: input, shape index: {}]   ;;  %s5525_s14 = inlined_call_operand.vmem [shape: bf16[2,32,32], index: 14, kind: input, shape index: {}]   ;;  %s5526_s15 = inlined_call_operand.hbm [shape: f32[2,1,32], index: 15, kind: input, shape index: {}]   ;;  %s5527_s16 = inlined_call_operand.vmem [shape: bf16[2,32,32], index: 16, kind: input, shape index: {}]   ;;  %s5528_s17 = inlined_call_operand.hbm [shape: f32[2,1,32], index: 17, kind: input, shape index: {}]   ;;  %s5529_s18 = inlined_call_operand.vmem [shape: bf16[2,32,32], index: 18, kind: input, shape index: {}]   ;;  %s5530_s19 = inlined_call_operand.hbm [shape: f32[2,1,32], index: 19, kind: input, shape index: {}]   ;;  %s5531_s20 = inlined_call_operand.hbm [shape: bf16[2,32,32], index: 20, kind: input, shape index: {}]   ;;  %s5532_s21 = inlined_call_operand.vmem [shape: f32[2,1,32], index: 21, kind: input, shape index: {}]   ;;  %s5533_s22 = inlined_call_operand.hbm [shape: f32[16,12], index: 22, kind: output, shape index: {0}]   ;;  %s5534_s23 = inlined_call_operand.hbm [shape: f32[1,1], index: 23, kind: output, shape index: {1}]  }
   0x1   :  { %5550 = sst [smem:[#allocation35_spill]] %s5511_s0 }
   0x2   :  { %5551 = sst [smem:[#allocation36_spill]] %s5512_s1  ;;  %s5569_s24 = sld [smem:[#allocation35_spill]] }
   0x3   :  { %5552 = sst [smem:[#allocation37_spill]] %s5513_s2 }
   0x4   :  { %5553 = sst [smem:[#allocation38_spill]] %s5514_s3 }
   0x5   :  { %5554 = sst [smem:[#allocation39_spill]] %s5515_s4 }
   0x6   :  { %5555 = sst [smem:[#allocation40_spill]] %s5516_s5 }
   0x7   :  { %5556 = sst [smem:[#allocation41_spill]] %s5517_s6 }
   0x8   :  { %5557 = sst [smem:[#allocation42_spill]] %s5518_s7 }
   0x9   :  { %5558 = sst [smem:[#allocation43_spill]] %s5521_s10 }
   0xa   :  { %5559 = sst [smem:[#allocation44_spill]] %s5522_s11 }
   0xb   :  { %5560 = sst [smem:[#allocation45_spill]] %s5523_s12 }
   0xc   :  { %5561 = sst [smem:[#allocation46_spill]] %s5524_s13 }
   0xd   :  { %5562 = sst [smem:[#allocation47_spill]] %s5525_s14 }
   0xe   :  { %5563 = sst [smem:[#allocation48_spill]] %s5527_s16 }
   0xf   :  { %5564 = sst [smem:[#allocation49_spill]] %s5528_s17 }
  0x10   :  { %5565 = sst [smem:[#allocation50_spill]] %s5529_s18 }
  0x11   :  { %5566 = sst [smem:[#allocation51_spill]] %s5532_s21 }
  0x12   :  { %5567 = sst [smem:[#allocation52_spill]] %s5533_s22 }
  0x13   :  { %5568 = sst [smem:[#allocation53_spill]] %s5534_s23 }
  0x14   :  { %29 = sst [smem:[#allocation3]] %s5569_s24 }
  0x15   :  { %30 = vsyncpa [#allocation5], 0 }
  0x16   :  { %32 = vsyncpa [#allocation5 + $0x1], 0 }
  0x17   :  { %33 = vsyncpa [#allocation8], 0 }
  0x18   :  { %35 = vsyncpa [#allocation8 + $0x1], 0 }
  0x19   :  { %36 = vsyncpa [#allocation11], 0 }
  0x1a   :  { %38 = vsyncpa [#allocation11 + $0x1], 0 }
  0x1b   :  { %39 = vsyncpa [#allocation14], 0 }
  0x1c   :  { %41 = vsyncpa [#allocation14 + $0x1], 0 }
  0x1d   :  { %42 = vsyncpa [#allocation17], 0 }
  0x1e   :  { %44 = vsyncpa [#allocation17 + $0x1], 0 }
  0x1f   :  { %45 = vsyncpa [#allocation20], 0 }
  0x20   :  { %47 = vsyncpa [#allocation20 + $0x1], 0 }
  0x21   :  { %48 = vsyncpa [#allocation6], 0 }
  0x22   :  { %49 = vsyncpa [#allocation23], 0  ;;  %s4785_s25 = smov 0   ;;  %s4787_s5 = smov 0  }
  0x23   :  { %s4789_s1 = smov 0   ;;  %s4791_s26 = smov 0  }
  0x24 LB: > { %5570 = sst [smem:[#allocation32_spill]] %s4636_s1  ;;  %s4804_s2 = sadd.s32 4294967295, %s4640_s26   ;;  %s4640_s26 = sphi %s4791_s26, %s5613_s26   ;;  %s4636_s1 = sphi %s4789_s1, %s5615_s1   ;;  %s4632_s5 = sphi %s4787_s5, %s5617_s5   ;;  %s4628_s25 = sphi %s4785_s25, %s5616_s25  }
  0x25   : > { %s4807_s6 = sadd.s32 1, %s4640_s26   ;;  %s135_s7 = sadd.s32 1, %s4636_s1 }
  0x26   : > { %5571 = sst [smem:[#allocation33_spill]] %s4807_s6  ;;  %s132_s27 = ssub.s32 %s4640_s26, %s4807_s6 }
  0x27   : > { %p133_p0 = scmp.eq.s32.totalorder %s132_s27, 0  ;;  %p142_p1 = scmp.ne.s32.totalorder %s4636_s1, %s4632_s5 }
  0x28   : > { %p143_p2 = scmp.eq.s32.totalorder %s4640_s26, 0  ;;  %p148_p3 = scmp.ne.s32.totalorder %s4632_s5, %s4628_s25 }
  0x29   : > { %s4817_s28 = scalar_select %p133_p0, %s4636_s1, %s135_s7  }
  0x2a   : > { %p144_p4 = por %p143_p2, %p142_p1  ;;  %p149_p5 = scmp.eq.s32.totalorder %s4804_s2, 0 }
  0x2b   : > { %5572 = sst [smem:[#allocation34_spill]] %s4817_s28  ;;  %p3973_p6 = scmp.lt.s32.totalorder %s4640_s26, 2 }
  0x2c   : > { %p4821_p7 = por %p149_p5, %p148_p3  ;;  %s4826_s3 = sand.u32 1, %s4636_s1  }
  0x2d   : > { %p4828_p8 = pnand %p3973_p6, %p144_p4  ;;  %s4833_s4 = sand.u32 1, %s4640_s26  }
  0x2e   : > { %s5573_s29 = scalar_select %p4821_p7, 1, 0 }
  0x2f   : > { %s5574_s0 = scalar_select %p4828_p8, 1, 0 }
  0x30   : > { %s3540_s30 = sshll.u32 %s4826_s3, 9  ;;  %s3743_s24 = sshll.u32 %s4640_s26, 13 }
  0x31   : > { %s724_s25 = scalar_lea.vmem [#allocation7], %s3540_s30  ;;  %s5575_s6 = sld [smem:[#allocation39_spill]] }
  0x32   : > { %s731_s27 = sshll.u32 %s724_s25, 4  ;;  %p4849_p10 = pneg %p4828_p8  ;;  %s4842_s27 = int_to_ptr.vmem [resolvable:$true] %s731_s27 }
  0x37   : > { %s4840_s23 = scalar_lea.hbm %s5575_s6, %s3743_s24  ;;  %s4231_s24 = scalar_lea.hbm %s5575_s6, 16384 }
  0x38   : > { %s4226_s22 = scalar_lea.hbm %s4840_s23, 8192  ;;  %p4232_p13 = scmp.lt.u32.totalorder %s4840_s23, %s5575_s6 }
  0x39   : > { %p4227_p9 = scmp.ne.s32.totalorder %s4840_s23, %s4226_s22  ;;  %p4233_p0 = scmp.lt.u32.totalorder %s4231_s24, %s4226_s22 }
  0x3a   : > { %p4235_p2 = scmp.lt.u32.totalorder %s4226_s22, %s4840_s23 }
  0x3b   : > { %p4229_p11 = pnand %p4849_p10, %p4227_p9  ;;  %p4234_p1 = por %p4233_p0, %p4232_p13 }
  0x3d   : > { %p4230_p12 = pneg %p4229_p11  ;;  %p4236_p3 = por %p4235_p2, %p4234_p1 }
  0x3f   : > { %p4237_p4 = pnand %p4236_p3, %p4230_p12 }
  0x41   : > { %4240 = shalt.err (!%p4237_p4)
}
  0x42   : > { %s4241_s1 = scalar_lea.vmem %s4842_s27, 8192  ;;  %s4642_s28 = smov [#allocation7]  }
  0x43   : > { %p4242_p5 = scmp.ne.s32.totalorder %s4842_s27, %s4241_s1  ;;  %s4246_s30 = sshll.u32 %s4642_s28, 4  ;;  %s4247_s30 = int_to_ptr.vmem [resolvable:$false] %s4246_s30 }
  0x44   : > { %s4248_s25 = scalar_lea.vmem %s4247_s30, 16384  ;;  %p4249_p11 = scmp.lt.s32.totalorder %s4842_s27, %s4247_s30 }
  0x45   : > { %p4244_p6 = pnand %p4242_p5, %p4849_p10  ;;  %p4250_p7 = scmp.lt.s32.totalorder %s4248_s25, %s4241_s1 }
  0x47   : > { %p4245_p9 = pneg %p4244_p6  ;;  %p4251_p13 = por %p4250_p7, %p4249_p11 }
  0x49   : > { %p4252_p0 = pnand %p4251_p13, %p4245_p9 }
  0x4b   : > { %4255 = shalt.err (!%p4252_p0)
}
  0x4c   : > { %s4643_s22 = smov 128   ;;  %s4644_s24 = smov 8  }
  0x4d   : > { %s5577_s7 = scalar_lea.sflag [#allocation8], %s4833_s4  ;;  %p3555_p12 = scmp.ge.s32.totalorder %s4640_s26, 1 }
  0x4e   : > { %3948 = dma.hbm_to_vmem [thread:$0]  (!%p4828_p8), %s4840_s23, 8192, %s4842_s27, %s5577_s7, %s4643_s22, %s4643_s22, %s4644_s24  }
  0x4f   : > { %p949_p1 = scmp.lt.s32.totalorder %s4640_s26, 3  ;;  %s4881_s28 = sshll.u32 %s4640_s26, 4 }
  0x50   : > { %s5579_s6 = sld [smem:[#allocation42_spill]]  ;;  %s771_s16 = scalar_lea.vmem [#allocation10], %s4826_s3 }
  0x51   : > { %p4876_p7 = pnand %p3555_p12, %p949_p1  ;;  %s778_s23 = sshll.u32 %s771_s16, 4  ;;  %s779_s23 = int_to_ptr.vmem [resolvable:$true] %s778_s23 }
  0x53   : > { %s5578_s1 = scalar_select %p4876_p7, 1, 0 }
  0x56   : > { %s4887_s18 = scalar_lea.hbm %s5579_s6, %s4881_s28  ;;  %s4261_s13 = scalar_lea.hbm %s5579_s6, 32 }
  0x57   : > { %s4256_s22 = scalar_lea.hbm %s4887_s18, 16  ;;  %p4262_p5 = scmp.lt.u32.totalorder %s4887_s18, %s5579_s6 }
  0x58   : > { %p4257_p2 = scmp.ne.s32.totalorder %s4887_s18, %s4256_s22  ;;  %p4263_p6 = scmp.lt.u32.totalorder %s4261_s13, %s4256_s22 }
  0x59   : > { %p4265_p11 = scmp.lt.u32.totalorder %s4256_s22, %s4887_s18 }
  0x5a   : > { %p4259_p3 = pnand %p4257_p2, %p4849_p10  ;;  %p4264_p9 = por %p4263_p6, %p4262_p5 }
  0x5c   : > { %p4260_p4 = pneg %p4259_p3  ;;  %p4266_p13 = por %p4265_p11, %p4264_p9 }
  0x5e   : > { %p4267_p0 = pnand %p4266_p13, %p4260_p4 }
  0x60   : > { %4270 = shalt.err (!%p4267_p0)
}
  0x61   : > { %s4271_s16 = scalar_lea.vmem %s779_s23, 16  ;;  %s4645_s27 = smov [#allocation10]  }
  0x62   : > { %p4272_p12 = scmp.ne.s32.totalorder %s779_s23, %s4271_s16  ;;  %s4276_s14 = sshll.u32 %s4645_s27, 4  ;;  %s4277_s14 = int_to_ptr.vmem [resolvable:$false] %s4276_s14 }
  0x63   : > { %s4278_s24 = scalar_lea.vmem %s4277_s14, 32  ;;  %p4279_p3 = scmp.lt.s32.totalorder %s779_s23, %s4277_s14 }
  0x64   : > { %p4274_p1 = pnand %p4272_p12, %p4849_p10  ;;  %p4280_p7 = scmp.lt.s32.totalorder %s4278_s24, %s4271_s16 }
  0x66   : > { %p4275_p2 = pneg %p4274_p1  ;;  %p4281_p8 = por %p4280_p7, %p4279_p3 }
  0x68   : > { %p4282_p5 = pnand %p4281_p8, %p4275_p2 }
  0x6a   : > { %4285 = shalt.err (!%p4282_p5)
}
  0x6b   : > { %p5580_p6 = scmp.ne.s32.totalorder %s5574_s0, 0  ;;  %s5581_s13 = scalar_lea.sflag [#allocation11], %s4833_s4 }
  0x6c   : > { %s5582_s11 = sld [smem:[#allocation44_spill]]  ;;  %s821_s14 = scalar_lea.vmem [#allocation13], %s4826_s3 }
  0x6d   : > { %3954 = dma.hbm_to_vmem [thread:$0]  (!%p5580_p6), %s4887_s18, 16, %s779_s23, %s5581_s13  }
  0x6e   : > { %s828_s30 = sshll.u32 %s821_s14, 4  ;;  %s829_s30 = int_to_ptr.vmem [resolvable:$true] %s828_s30 }
  0x72   : > { %s4914_s27 = scalar_lea.hbm %s5582_s11, %s4881_s28  ;;  %s4291_s23 = scalar_lea.hbm %s5582_s11, 32 }
  0x73   : > { %s4286_s16 = scalar_lea.hbm %s4914_s27, 16  ;;  %p4292_p9 = scmp.lt.u32.totalorder %s4914_s27, %s5582_s11 }
  0x74   : > { %p4287_p8 = scmp.ne.s32.totalorder %s4914_s27, %s4286_s16  ;;  %p4293_p11 = scmp.lt.u32.totalorder %s4291_s23, %s4286_s16 }
  0x75   : > { %p4295_p0 = scmp.lt.u32.totalorder %s4286_s16, %s4914_s27 }
  0x76   : > { %p4289_p7 = pnand %p4287_p8, %p4849_p10  ;;  %p4294_p13 = por %p4293_p11, %p4292_p9 }
  0x78   : > { %p4290_p4 = pneg %p4289_p7  ;;  %p4296_p12 = por %p4295_p0, %p4294_p13 }
  0x7a   : > { %p4297_p1 = pnand %p4296_p12, %p4290_p4 }
  0x7c   : > { %4300 = shalt.err (!%p4297_p1)
}
  0x7d   : > { %s4301_s7 = scalar_lea.vmem %s829_s30, 16  ;;  %s4646_s14 = smov [#allocation13]  }
  0x7e   : > { %p4302_p2 = scmp.ne.s32.totalorder %s829_s30, %s4301_s7  ;;  %s4306_s25 = sshll.u32 %s4646_s14, 4  ;;  %s4307_s25 = int_to_ptr.vmem [resolvable:$false] %s4306_s25 }
  0x7f   : > { %s4308_s24 = scalar_lea.vmem %s4307_s25, 32  ;;  %p4309_p8 = scmp.lt.s32.totalorder %s829_s30, %s4307_s25 }
  0x80   : > { %p4304_p3 = pnand %p4302_p2, %p4849_p10  ;;  %p4310_p7 = scmp.lt.s32.totalorder %s4308_s24, %s4301_s7 }
  0x82   : > { %p4305_p5 = pneg %p4304_p3  ;;  %p4311_p6 = por %p4310_p7, %p4309_p8 }
  0x84   : > { %p4312_p9 = pnand %p4311_p6, %p4305_p5 }
  0x86   : > { %4315 = shalt.err (!%p4312_p9)
}
  0x87   : > { %p5583_p11 = scmp.ne.s32.totalorder %s5574_s0, 0  ;;  %s5584_s16 = scalar_lea.sflag [#allocation14], %s4833_s4 }
  0x88   : > { %s5585_s17 = sld [smem:[#allocation49_spill]]  ;;  %s885_s25 = scalar_lea.vmem [#allocation16], %s4826_s3 }
  0x89   : > { %3960 = dma.hbm_to_vmem [thread:$0]  (!%p5583_p11), %s4914_s27, 16, %s829_s30, %s5584_s16  }
  0x8a   : > { %s892_s22 = sshll.u32 %s885_s25, 4  ;;  %s893_s22 = int_to_ptr.vmem [resolvable:$true] %s892_s22 }
  0x8e   : > { %s4941_s13 = scalar_lea.hbm %s5585_s17, %s4881_s28  ;;  %s4321_s30 = scalar_lea.hbm %s5585_s17, 32 }
  0x8f   : > { %s4316_s14 = scalar_lea.hbm %s4941_s13, 16  ;;  %p4322_p0 = scmp.lt.u32.totalorder %s4941_s13, %s5585_s17 }
  0x90   : > { %p4317_p6 = scmp.ne.s32.totalorder %s4941_s13, %s4316_s14  ;;  %p4323_p12 = scmp.lt.u32.totalorder %s4321_s30, %s4316_s14 }
  0x91   : > { %p4325_p2 = scmp.lt.u32.totalorder %s4316_s14, %s4941_s13 }
  0x92   : > { %p4319_p4 = pnand %p4317_p6, %p4849_p10  ;;  %p4324_p1 = por %p4323_p12, %p4322_p0 }
  0x94   : > { %p4320_p13 = pneg %p4319_p4  ;;  %p4326_p3 = por %p4325_p2, %p4324_p1 }
  0x96   : > { %p4327_p5 = pnand %p4326_p3, %p4320_p13 }
  0x98   : > { %4330 = shalt.err (!%p4327_p5)
}
  0x99   : > { %s4331_s23 = scalar_lea.vmem %s893_s22, 16  ;;  %s4647_s25 = smov [#allocation16]  }
  0x9a   : > { %p4332_p8 = scmp.ne.s32.totalorder %s893_s22, %s4331_s23  ;;  %s4336_s7 = sshll.u32 %s4647_s25, 4  ;;  %s4337_s7 = int_to_ptr.vmem [resolvable:$false] %s4336_s7 }
  0x9b   : > { %s4338_s24 = scalar_lea.vmem %s4337_s7, 32  ;;  %p4339_p6 = scmp.lt.s32.totalorder %s893_s22, %s4337_s7 }
  0x9c   : > { %p4334_p7 = pnand %p4332_p8, %p4849_p10  ;;  %p4340_p4 = scmp.lt.s32.totalorder %s4338_s24, %s4331_s23 }
  0x9e   : > { %p4335_p9 = pneg %p4334_p7  ;;  %p4341_p11 = por %p4340_p4, %p4339_p6 }
  0xa0   : > { %p4342_p0 = pnand %p4341_p11, %p4335_p9 }
  0xa2   : > { %4345 = shalt.err (!%p4342_p0)
}
  0xa3   : > { %p5586_p12 = scmp.ne.s32.totalorder %s5574_s0, 0  ;;  %s5587_s14 = scalar_lea.sflag [#allocation17], %s4833_s4 }
  0xa4   : > { %s3537_s27 = sshll.u32 %s4826_s3, 2  ;;  %s3742_s30 = sshll.u32 %s4640_s26, 6 }
  0xa5   : > { %3966 = dma.hbm_to_vmem [thread:$0]  (!%p5586_p12), %s4941_s13, 16, %s893_s22, %s5587_s14  }
  0xa6   : > { %s5588_s7 = sld [smem:[#allocation38_spill]]  ;;  %s705_s25 = scalar_lea.vmem [#allocation4], %s3537_s27 }
  0xa7   : > { %s713_s24 = sshll.u32 %s705_s25, 4  ;;  %s3543_s6 = sshll.u32 %s4826_s3, 1  ;;  %s714_s24 = int_to_ptr.vmem [resolvable:$true] %s713_s24 }
  0xa8   : > { %s702_s11 = scalar_lea.sflag [#allocation5], %s4826_s3 }
  0xac   : > { %s4969_s23 = scalar_lea.hbm %s5588_s7, %s3742_s30  ;;  %s4351_s14 = scalar_lea.hbm %s5588_s7, 128 }
  0xad   : > { %s4346_s17 = scalar_lea.hbm %s4969_s23, 64  ;;  %p4352_p2 = scmp.lt.u32.totalorder %s4969_s23, %s5588_s7 }
  0xae   : > { %p4347_p11 = scmp.ne.s32.totalorder %s4969_s23, %s4346_s17  ;;  %p4353_p3 = scmp.lt.u32.totalorder %s4351_s14, %s4346_s17 }
  0xaf   : > { %p4355_p8 = scmp.lt.u32.totalorder %s4346_s17, %s4969_s23 }
  0xb0   : > { %p4349_p13 = pnand %p4347_p11, %p4849_p10  ;;  %p4354_p5 = por %p4353_p3, %p4352_p2 }
  0xb2   : > { %p4350_p1 = pneg %p4349_p13  ;;  %p4356_p7 = por %p4355_p8, %p4354_p5 }
  0xb4   : > { %p4357_p9 = pnand %p4356_p7, %p4350_p1 }
  0xb6   : > { %4360 = shalt.err (!%p4357_p9)
}
  0xb7   : > { %s4361_s27 = scalar_lea.vmem %s714_s24, 64  ;;  %s4648_s18 = smov [#allocation4]  }
  0xb8   : > { %p4362_p6 = scmp.ne.s32.totalorder %s714_s24, %s4361_s27  ;;  %s4366_s25 = sshll.u32 %s4648_s18, 4  ;;  %s4367_s25 = int_to_ptr.vmem [resolvable:$false] %s4366_s25 }
  0xb9   : > { %s4368_s13 = scalar_lea.vmem %s4367_s25, 128  ;;  %p4369_p11 = scmp.lt.s32.totalorder %s714_s24, %s4367_s25 }
  0xba   : > { %p4364_p4 = pnand %p4362_p6, %p4849_p10  ;;  %p4370_p13 = scmp.lt.s32.totalorder %s4368_s13, %s4361_s27 }
  0xbc   : > { %p4365_p0 = pneg %p4364_p4  ;;  %p4371_p12 = por %p4370_p13, %p4369_p11 }
  0xbe   : > { %p4372_p2 = pnand %p4371_p12, %p4365_p0 }
  0xc0   : > { %4375 = shalt.err (!%p4372_p2)
}
  0xc1   : > { %p5589_p3 = scmp.ne.s32.totalorder %s5574_s0, 0  ;;  %s3744_s17 = sshll.u32 %s4640_s26, 5 }
  0xc2   : > { %s745_s22 = scalar_lea.vmem [#allocation9], %s3543_s6  ;;  %s5590_s18 = sld [smem:[#allocation40_spill]] }
  0xc3   : > { %3945 = dma.hbm_to_vmem [thread:$0]  (!%p5589_p3), %s4969_s23, 64, %s714_s24, %s702_s11  }
  0xc4   : > { %s753_s14 = sshll.u32 %s745_s22, 4  ;;  %s754_s14 = int_to_ptr.vmem [resolvable:$true] %s753_s14 }
  0xc8   : > { %s751_s7 = scalar_lea.hbm %s5590_s18, %s3744_s17  ;;  %s4381_s12 = scalar_lea.hbm %s5590_s18, 64 }
  0xc9   : > { %s4376_s27 = scalar_lea.hbm %s751_s7, 32  ;;  %p4382_p8 = scmp.lt.u32.totalorder %s751_s7, %s5590_s18 }
  0xca   : > { %p4377_p1 = scmp.ne.s32.totalorder %s751_s7, %s4376_s27  ;;  %p4383_p7 = scmp.lt.u32.totalorder %s4381_s12, %s4376_s27 }
  0xcb   : > { %p4385_p6 = scmp.lt.u32.totalorder %s4376_s27, %s751_s7 }
  0xcc   : > { %p4379_p12 = pnand %p4377_p1, %p4849_p10  ;;  %p4384_p9 = por %p4383_p7, %p4382_p8 }
  0xce   : > { %p4380_p5 = pneg %p4379_p12  ;;  %p4386_p4 = por %p4385_p6, %p4384_p9 }
  0xd0   : > { %p4387_p0 = pnand %p4386_p4, %p4380_p5 }
  0xd2   : > { %4390 = shalt.err (!%p4387_p0)
}
  0xd3   : > { %s4391_s6 = scalar_lea.vmem %s754_s14, 32  ;;  %s4649_s23 = smov [#allocation9]  }
  0xd4   : > { %p4392_p11 = scmp.ne.s32.totalorder %s754_s14, %s4391_s6  ;;  %s4396_s24 = sshll.u32 %s4649_s23, 4  ;;  %s4397_s24 = int_to_ptr.vmem [resolvable:$false] %s4396_s24 }
  0xd5   : > { %s4398_s17 = scalar_lea.vmem %s4397_s24, 64  ;;  %p4399_p1 = scmp.lt.s32.totalorder %s754_s14, %s4397_s24 }
  0xd6   : > { %p4394_p13 = pnand %p4392_p11, %p4849_p10  ;;  %p4400_p12 = scmp.lt.s32.totalorder %s4398_s17, %s4391_s6 }
  0xd8   : > { %p4395_p2 = pneg %p4394_p13  ;;  %p4401_p3 = por %p4400_p12, %p4399_p1 }
  0xda   : > { %p4402_p7 = pnand %p4401_p3, %p4395_p2 }
  0xdc   : > { %4405 = shalt.err (!%p4402_p7)
}
  0xdd   : > { %p5591_p8 = scmp.ne.s32.totalorder %s5574_s0, 0  ;;  %s5592_s10 = scalar_lea.sflag [#allocation8], %s4833_s4 }
  0xde   : > { %s5014_s30 = scalar_lea.hbm %s5520_s9, %s4881_s28  ;;  %s796_s16 = scalar_lea.vmem [#allocation12], %s4826_s3 }
  0xdf   : > { %3951 = dma.hbm_to_vmem [thread:$0]  (!%p5591_p8), %s751_s7, 32, %s754_s14, %s5592_s10  }
  0xe0   : > { %s803_s27 = sshll.u32 %s796_s16, 4  ;;  %s5021_s11 = scalar_lea.hbm %s5526_s15, %s4881_s28  ;;  %s804_s27 = int_to_ptr.vmem [resolvable:$true] %s803_s27 }
  0xe1   : > { %s4406_s6 = scalar_lea.hbm %s5014_s30, 16  ;;  %s4411_s23 = scalar_lea.hbm %s5520_s9, 32 }
  0xe2   : > { %p4407_p3 = scmp.ne.s32.totalorder %s5014_s30, %s4406_s6  ;;  %p4412_p6 = scmp.lt.u32.totalorder %s5014_s30, %s5520_s9 }
  0xe3   : > { %p4413_p4 = scmp.lt.u32.totalorder %s4411_s23, %s4406_s6  ;;  %p4415_p11 = scmp.lt.u32.totalorder %s4406_s6, %s5014_s30 }
  0xe4   : > { %p4409_p5 = pnand %p4407_p3, %p4849_p10 }
  0xe5   : > { %p4414_p0 = por %p4413_p4, %p4412_p6 }
  0xe6   : > { %p4410_p9 = pneg %p4409_p5 }
  0xe7   : > { %p4416_p13 = por %p4415_p11, %p4414_p0 }
  0xe9   : > { %p4417_p2 = pnand %p4416_p13, %p4410_p9 }
  0xeb   : > { %4420 = shalt.err (!%p4417_p2)
}
  0xec   : > { %s4421_s10 = scalar_lea.vmem %s804_s27, 16  ;;  %s4650_s12 = smov [#allocation12]  }
  0xed   : > { %p4422_p1 = scmp.ne.s32.totalorder %s804_s27, %s4421_s10  ;;  %s4426_s22 = sshll.u32 %s4650_s12, 4  ;;  %s4427_s22 = int_to_ptr.vmem [resolvable:$false] %s4426_s22 }
  0xee   : > { %s4428_s16 = scalar_lea.vmem %s4427_s22, 32  ;;  %p4429_p3 = scmp.lt.s32.totalorder %s804_s27, %s4427_s22 }
  0xef   : > { %p4424_p12 = pnand %p4422_p1, %p4849_p10  ;;  %p4430_p5 = scmp.lt.s32.totalorder %s4428_s16, %s4421_s10 }
  0xf1   : > { %p4425_p7 = pneg %p4424_p12  ;;  %p4431_p8 = por %p4430_p5, %p4429_p3 }
  0xf3   : > { %p4432_p4 = pnand %p4431_p8, %p4425_p7 }
  0xf5   : > { %4435 = shalt.err (!%p4432_p4)
}
  0xf6   : > { %p5593_p6 = scmp.ne.s32.totalorder %s5574_s0, 0  ;;  %s5594_s25 = scalar_lea.sflag [#allocation11], %s4833_s4 }
  0xf7   : > { %s860_s13 = scalar_lea.vmem [#allocation15], %s4826_s3  ;;  %s5047_s23 = scalar_lea.hbm %s5530_s19, %s4881_s28 }
  0xf8   : > { %3957 = dma.hbm_to_vmem [thread:$0]  (!%p5593_p6), %s5014_s30, 16, %s804_s27, %s5594_s25  }
  0xf9   : > { %s867_s6 = sshll.u32 %s860_s13, 4  ;;  %s4436_s24 = scalar_lea.hbm %s5021_s11, 16  ;;  %s868_s6 = int_to_ptr.vmem [resolvable:$true] %s867_s6 }
  0xfa   : > { %p4437_p8 = scmp.ne.s32.totalorder %s5021_s11, %s4436_s24  ;;  %s4441_s12 = scalar_lea.hbm %s5526_s15, 32 }
  0xfb   : > { %p4442_p11 = scmp.lt.u32.totalorder %s5021_s11, %s5526_s15  ;;  %p4443_p13 = scmp.lt.u32.totalorder %s4441_s12, %s4436_s24 }
  0xfc   : > { %p4439_p9 = pnand %p4437_p8, %p4849_p10  ;;  %p4445_p1 = scmp.lt.u32.totalorder %s4436_s24, %s5021_s11 }
  0xfd   : > { %p4444_p2 = por %p4443_p13, %p4442_p11 }
  0xfe   : > { %p4440_p0 = pneg %p4439_p9 }
  0xff   : > { %p4446_p12 = por %p4445_p1, %p4444_p2 }
 0x101   : > { %p4447_p7 = pnand %p4446_p12, %p4440_p0 }
 0x103   : > { %4450 = shalt.err (!%p4447_p7)
}
 0x104   : > { %s4451_s28 = scalar_lea.vmem %s868_s6, 16  ;;  %s4651_s30 = smov [#allocation15]  }
 0x105   : > { %p4452_p3 = scmp.ne.s32.totalorder %s868_s6, %s4451_s28  ;;  %s4456_s27 = sshll.u32 %s4651_s30, 4  ;;  %s4457_s27 = int_to_ptr.vmem [resolvable:$false] %s4456_s27 }
 0x106   : > { %s4458_s25 = scalar_lea.vmem %s4457_s27, 32  ;;  %p4459_p8 = scmp.lt.s32.totalorder %s868_s6, %s4457_s27 }
 0x107   : > { %p4454_p5 = pnand %p4452_p3, %p4849_p10  ;;  %p4460_p9 = scmp.lt.s32.totalorder %s4458_s25, %s4451_s28 }
 0x109   : > { %p4455_p4 = pneg %p4454_p5  ;;  %p4461_p6 = por %p4460_p9, %p4459_p8 }
 0x10b   : > { %p4462_p11 = pnand %p4461_p6, %p4455_p4 }
 0x10d   : > { %4465 = shalt.err (!%p4462_p11)
}
 0x10e   : > { %p5595_p13 = scmp.ne.s32.totalorder %s5574_s0, 0  ;;  %s5596_s13 = scalar_lea.sflag [#allocation14], %s4833_s4 }
 0x10f   : > { %s910_s7 = scalar_lea.vmem [#allocation18], %s4826_s3  ;;  %s3552_s24 = sshll.u32 %s4826_s3, 4 }
 0x110   : > { %3963 = dma.hbm_to_vmem [thread:$0]  (!%p5595_p13), %s5021_s11, 16, %s868_s6, %s5596_s13  }
 0x111   : > { %s917_s14 = sshll.u32 %s910_s7, 4  ;;  %s4466_s17 = scalar_lea.hbm %s5047_s23, 16  ;;  %s918_s14 = int_to_ptr.vmem [resolvable:$true] %s917_s14 }
 0x112   : > { %p4467_p6 = scmp.ne.s32.totalorder %s5047_s23, %s4466_s17  ;;  %s4471_s22 = scalar_lea.hbm %s5530_s19, 32 }
 0x113   : > { %p4472_p1 = scmp.lt.u32.totalorder %s5047_s23, %s5530_s19  ;;  %p4473_p12 = scmp.lt.u32.totalorder %s4471_s22, %s4466_s17 }
 0x114   : > { %p4469_p0 = pnand %p4467_p6, %p4849_p10  ;;  %p4475_p3 = scmp.lt.u32.totalorder %s4466_s17, %s5047_s23 }
 0x115   : > { %p4474_p7 = por %p4473_p12, %p4472_p1 }
 0x116   : > { %p4470_p2 = pneg %p4469_p0 }
 0x117   : > { %p4476_p5 = por %p4475_p3, %p4474_p7 }
 0x119   : > { %p4477_p4 = pnand %p4476_p5, %p4470_p2 }
 0x11b   : > { %4480 = shalt.err (!%p4477_p4)
}
 0x11c   : > { %s4481_s11 = scalar_lea.vmem %s918_s14, 16  ;;  %s4652_s6 = smov [#allocation18]  }
 0x11d   : > { %p4482_p8 = scmp.ne.s32.totalorder %s918_s14, %s4481_s11  ;;  %s4486_s30 = sshll.u32 %s4652_s6, 4  ;;  %s4487_s30 = int_to_ptr.vmem [resolvable:$false] %s4486_s30 }
 0x11e   : > { %s4488_s27 = scalar_lea.vmem %s4487_s30, 32  ;;  %p4489_p6 = scmp.lt.s32.totalorder %s918_s14, %s4487_s30 }
 0x11f   : > { %p4484_p9 = pnand %p4482_p8, %p4849_p10  ;;  %p4490_p0 = scmp.lt.s32.totalorder %s4488_s27, %s4481_s11 }
 0x121   : > { %p4485_p11 = pneg %p4484_p9  ;;  %p4491_p13 = por %p4490_p0, %p4489_p6 }
 0x123   : > { %p4492_p1 = pnand %p4491_p13, %p4485_p11 }
 0x125   : > { %4495 = shalt.err (!%p4492_p1)
}
 0x126   : > { %p5597_p12 = scmp.ne.s32.totalorder %s5574_s0, 0  ;;  %s5598_s25 = scalar_lea.sflag [#allocation17], %s4833_s4 }
 0x127   : > { %s3745_s13 = sshll.u32 %s4640_s26, 8  ;;  %s928_s12 = scalar_lea.vmem [#allocation19], %s3552_s24 }
 0x128   : > { %3969 = dma.hbm_to_vmem [thread:$0]  (!%p5597_p12), %s5047_s23, 16, %s918_s14, %s5598_s25  }
 0x129   : > { %s5093_s10 = scalar_lea.hbm %s5531_s20, %s3745_s13  ;;  %s935_s22 = sshll.u32 %s928_s12, 4  ;;  %s5097_s22 = int_to_ptr.vmem [resolvable:$true] %s935_s22 }
 0x12a   : > { %s925_s4 = scalar_lea.sflag [#allocation20], %s4826_s3  ;;  %s4496_s16 = scalar_lea.hbm %s5093_s10, 256 }
 0x12b   : > { %p4497_p13 = scmp.ne.s32.totalorder %s5093_s10, %s4496_s16  ;;  %s4501_s14 = scalar_lea.hbm %s5531_s20, 512 }
 0x12c   : > { %p4502_p3 = scmp.lt.u32.totalorder %s5093_s10, %s5531_s20  ;;  %p4503_p5 = scmp.lt.u32.totalorder %s4501_s14, %s4496_s16 }
 0x12d   : > { %p4499_p2 = pnand %p4497_p13, %p4849_p10  ;;  %p4505_p8 = scmp.lt.u32.totalorder %s4496_s16, %s5093_s10 }
 0x12e   : > { %p4504_p4 = por %p4503_p5, %p4502_p3 }
 0x12f   : > { %p4500_p7 = pneg %p4499_p2 }
 0x130   : > { %p4506_p9 = por %p4505_p8, %p4504_p4 }
 0x132   : > { %p4507_p11 = pnand %p4506_p9, %p4500_p7 }
 0x134   : > { %4510 = shalt.err (!%p4507_p11)
}
 0x135   : > { %s4511_s24 = scalar_lea.vmem %s5097_s22, 256  ;;  %s4653_s6 = smov [#allocation19]  }
 0x136   : > { %p4512_p6 = scmp.ne.s32.totalorder %s5097_s22, %s4511_s24  ;;  %s4516_s30 = sshll.u32 %s4653_s6, 4  ;;  %s4517_s30 = int_to_ptr.vmem [resolvable:$false] %s4516_s30 }
 0x137   : > { %s4518_s27 = scalar_lea.vmem %s4517_s30, 512  ;;  %p4519_p13 = scmp.lt.s32.totalorder %s5097_s22, %s4517_s30 }
 0x138   : > { %p4514_p0 = pnand %p4512_p6, %p4849_p10  ;;  %p4520_p2 = scmp.lt.s32.totalorder %s4518_s27, %s4511_s24 }
 0x13a   : > { %p4515_p1 = pneg %p4514_p0  ;;  %p4521_p3 = por %p4520_p2, %p4519_p13 }
 0x13c   : > { %p4522_p5 = pnand %p4521_p3, %p4515_p1 }
 0x13e   : > { %4525 = shalt.err (!%p4522_p5)
}
 0x13f   : > { %s4654_s25 = smov 64   ;;  %s4655_s13 = smov 4  }
 0x140   : > { %3972 = dma.hbm_to_vmem [thread:$0]  (!%p5597_p12), %s5093_s10, 256, %s5097_s22, %s925_s4, %s4654_s25, %s4654_s25, %s4655_s13  }
 0x141   : > { %p5599_p10 = scmp.ne.s32.totalorder %s5578_s1, 0 }
 0x142   : > { %s5126_s21 = sand.u32 (!%p5599_p10), 1, %s4632_s5   ;;  %p5600_p7 = scmp.ne.s32.totalorder (!%p5599_p10), %s5573_s29, 0 }
 0x143   : > { %953 = sbr.rel (%p5599_p10) target bundleno = 3424 (0xd60), region = 108  ;;  %s3556_s7 = sshll.u32 (!%p5599_p10), %s5126_s21, 2 }
 0x144   : > { %s956_s17 = scalar_lea.sflag (!%p5599_p10), [#allocation5], %s5126_s21  ;;  %s5130_s12 = scalar_lea.vmem (!%p5599_p10), [#allocation4], %s3556_s7 }
 0x14a   : > { %4595 = dma.done.wait (%p5600_p7), %s956_s17, 64  }
 0x14b   : > { %4597 = vsyncadd (%p5600_p7), %s956_s17, 4294967232  ;;  %s964_s3 = sand.u32 1, %s4804_s2   ;;  %s3557_s0 = sshll.u32 %s5126_s21, 9 }
 0x14c   : > { %s965_s1 = scalar_lea.sflag [#allocation8], %s964_s3  ;;  %s5138_s10 = scalar_lea.vmem [#allocation7], %s3557_s0 }
 0x14d   : > { %4599 = dma.done.wait (%p5600_p7), %s965_s1, 8224  }
 0x14e   : > { %4601 = vsyncadd (%p5600_p7), %s965_s1, 4294959072  ;;  %s3558_s22 = sshll.u32 %s5126_s21, 1  ;;  %s983_s16 = scalar_lea.sflag [#allocation11], %s964_s3 }
 0x14f   : > { %s5145_s4 = scalar_lea.vmem [#allocation9], %s3558_s22  ;;  %s985_s26 = scalar_lea.vmem [#allocation10], %s5126_s21 }
 0x150   : > { %4603 = dma.done.wait (%p5600_p7), %s983_s16, 32  }
 0x151   : > { %4605 = vsyncadd (%p5600_p7), %s983_s16, 4294967264  ;;  %s993_s23 = scalar_lea.vmem [#allocation12], %s5126_s21  ;;  %s999_s14 = scalar_lea.sflag [#allocation14], %s964_s3 }
 0x152   : > { %s1001_s28 = scalar_lea.vmem [#allocation13], %s5126_s21 }
 0x153   : > { %4607 = dma.done.wait (%p5600_p7), %s999_s14, 32  }
 0x154   : > { %4609 = vsyncadd (%p5600_p7), %s999_s14, 4294967264  ;;  %s1009_s11 = scalar_lea.vmem [#allocation15], %s5126_s21  ;;  %s1015_s24 = scalar_lea.sflag [#allocation17], %s964_s3 }
 0x155   : > { %s1017_s6 = scalar_lea.vmem [#allocation16], %s5126_s21 }
 0x156   : > { %4611 = dma.done.wait (%p5600_p7), %s1015_s24, 32  }
 0x157   : > { %4613 = vsyncadd (%p5600_p7), %s1015_s24, 4294967264  ;;  %s3559_s30 = sshll.u32 %s5126_s21, 4  ;;  %s1025_s27 = scalar_lea.vmem [#allocation18], %s5126_s21 }
 0x158   : > { %s1031_s25 = scalar_lea.sflag [#allocation20], %s5126_s21  ;;  %s5167_s13 = scalar_lea.vmem [#allocation19], %s3559_s30 }
 0x159   : > { %4615 = dma.done.wait (%p5600_p7), %s1031_s25, 256  }
 0x15a   : > { %4617 = vsyncadd (%p5600_p7), %s1031_s25, 4294967040  ;;  %p1182_p12 = scmp.lt.s32.totalorder %s4804_s2, 1  ;;  %v4656_v0 = vmov 0   ;;  %s5601_s1 = sld [smem:[#allocation37_spill]]  ;;  %v4070_v16 = vld [vmem:[%s5138_s10 + $0x4] ss:$8 sps:$4 sm:$0xff]  }
 0x15b   : > { %1496 = vmatprep.mubr.bf16.mxu1 %v4656_v0  ;;  %s5602_s24 = sld [smem:[#allocation36_spill]]  ;;  %v4072_v17 = vld [vmem:[%s5138_s10] ss:$8 sps:$4 sm:$0xff]   ;;  %v4073_v18 = vld [vmem:[%s5138_s10 + $0x14] ss:$8 sps:$4 sm:$0xff]   ;;  %1990 = vmatprep.subr.bf16.mxu0 %v4070_v16  ;;  %s5603_s0 = sld [smem:[#allocation41_spill]] }
 0x15c   : > { %s5176_s7 = scalar_select %p1182_p12, %s4804_s2, 1  ;;  %1991 = vmatpush1.bf16.msra.mxu0 %v4072_v17  ;;  %v4075_v20 = vld [vmem:[%s5138_s10 + $0x10] ss:$8 sps:$4 sm:$0xff]   ;;  %v4076_v22 = vld [vmem:[%s5138_s10 + $0x24] ss:$8 sps:$4 sm:$0xff]   ;;  %vm2337_vm0 = vcmask 523264  }
 0x15d   : > { %1992 = vmatprep.subr.bf16.mxu0 %v4073_v18  ;;  %v4078_v26 = vld [vmem:[%s5138_s10 + $0x20] ss:$8 sps:$4 sm:$0xff]   ;;  %v4079_v27 = vld [vmem:[%s5138_s10 + $0x34] ss:$8 sps:$4 sm:$0xff]   ;;  %v4081_v30 = vld [vmem:[%s5138_s10 + $0x30] ss:$8 sps:$4 sm:$0xff]  }
 0x15e   : > { %s3747_s17 = sshll.u32 %s5176_s7, 8  ;;  %s5190_s29 = sshll.u32 %s5176_s7, 4  ;;  %v4082_v31 = vld [vmem:[%s5138_s10 + $0x44] ss:$8 sps:$4 sm:$0xff]   ;;  %v4084_v35 = vld [vmem:[%s5138_s10 + $0x40] ss:$8 sps:$4 sm:$0xff]  }
 0x15f   : > { %v4085_v37 = vld [vmem:[%s5138_s10 + $0x54] ss:$8 sps:$4 sm:$0xff]   ;;  %v4087_v39 = vld [vmem:[%s5138_s10 + $0x50] ss:$8 sps:$4 sm:$0xff]   ;;  %v4088_v40 = vld [vmem:[%s5138_s10 + $0x64] ss:$8 sps:$4 sm:$0xff]  }
 0x160   : > { %s5182_s22 = scalar_lea.vmem %s5601_s1, %s3747_s17  ;;  %1993 = vmatpush1.bf16.msra.mxu0 %v4075_v20  ;;  %v4090_v43 = vld [vmem:[%s5138_s10 + $0x60] ss:$8 sps:$4 sm:$0xff]   ;;  %v4091_v44 = vld [vmem:[%s5138_s10 + $0x74] ss:$8 sps:$4 sm:$0xff]   ;;  %v4093_v47 = vld [vmem:[%s5138_s10 + $0x70] ss:$8 sps:$4 sm:$0xff]  }
 0x161   : > { %v4020_v1 = vld [vmem:[%s5182_s22 + $0x4] ss:$16 sps:$4 sm:$0xff]   ;;  %v4022_v2 = vld [vmem:[%s5182_s22] ss:$16 sps:$4 sm:$0xff]   ;;  %s5198_s30 = scalar_lea.vmem %s5602_s24, %s5190_s29  ;;  %v4047_v21 = vld [vmem:[%s5182_s22 + $0xc] ss:$16 sps:$4 sm:$0xff]   ;;  %1994 = vmatprep.subr.bf16.mxu0 %v4076_v22 }
 0x162   : > { %1464 = vmatprep.subr.bf16.mxu1 %v4020_v1  ;;  %v4023_v3 = vld [vmem:[%s5182_s22 + $0x24] ss:$16 sps:$4 sm:$0xff]   ;;  %v4025_v4 = vld [vmem:[%s5182_s22 + $0x20] ss:$16 sps:$4 sm:$0xff]   ;;  %v4045_v24 = vld [vmem:[%s5182_s22 + $0x8] ss:$16 sps:$4 sm:$0xff]  }
 0x163   : > { %1465 = vmatpush1.bf16.msra.mxu1 %v4022_v2  ;;  %v4026_v5 = vld [vmem:[%s5182_s22 + $0x44] ss:$16 sps:$4 sm:$0xff]   ;;  %v4028_v6 = vld [vmem:[%s5182_s22 + $0x40] ss:$16 sps:$4 sm:$0xff]   ;;  %v4050_v25 = vld [vmem:[%s5182_s22 + $0x2c] ss:$16 sps:$4 sm:$0xff]  }
 0x164   : > { %1466 = vmatprep.subr.bf16.mxu1 %v4023_v3  ;;  %v4029_v7 = vld [vmem:[%s5182_s22 + $0x64] ss:$16 sps:$4 sm:$0xff]   ;;  %v4031_v8 = vld [vmem:[%s5182_s22 + $0x60] ss:$16 sps:$4 sm:$0xff]   ;;  %v4048_v28 = vld [vmem:[%s5182_s22 + $0x28] ss:$16 sps:$4 sm:$0xff]   ;;  %1995 = vmatpush1.bf16.msra.mxu0 %v4078_v26 }
 0x165   : > { %v4032_v9 = vld [vmem:[%s5182_s22 + $0x84] ss:$16 sps:$4 sm:$0xff]   ;;  %v4034_v10 = vld [vmem:[%s5182_s22 + $0x80] ss:$16 sps:$4 sm:$0xff]   ;;  %v4053_v29 = vld [vmem:[%s5182_s22 + $0x4c] ss:$16 sps:$4 sm:$0xff]   ;;  %1996 = vmatprep.subr.bf16.mxu0 %v4079_v27 }
 0x166   : > { %v4035_v11 = vld [vmem:[%s5182_s22 + $0xa4] ss:$16 sps:$4 sm:$0xff]   ;;  %v4037_v12 = vld [vmem:[%s5182_s22 + $0xa0] ss:$16 sps:$4 sm:$0xff]   ;;  %v5229_v32 = vld [vmem:[%s5198_s30 + $0x8] sm:$0xff]   ;;  %s3748_s25 = sshll.u32 %s5176_s7, 7 }
 0x167   : > { %1467 = vmatpush1.bf16.msra.mxu1 %v4025_v4  ;;  %v4038_v13 = vld [vmem:[%s5182_s22 + $0xc4] ss:$16 sps:$4 sm:$0xff]   ;;  %v4040_v14 = vld [vmem:[%s5182_s22 + $0xc0] ss:$16 sps:$4 sm:$0xff]   ;;  %v4051_v33 = vld [vmem:[%s5182_s22 + $0x48] ss:$16 sps:$4 sm:$0xff]   ;;  %s5275_s1 = scalar_lea.vmem %s5603_s0, %s3748_s25 }
 0x168   : > { %1468 = vmatprep.subr.bf16.mxu1 %v4026_v5  ;;  %v4041_v15 = vld [vmem:[%s5182_s22 + $0xe4] ss:$16 sps:$4 sm:$0xff]   ;;  %v4043_v19 = vld [vmem:[%s5182_s22 + $0xe0] ss:$16 sps:$4 sm:$0xff]   ;;  %v4056_v34 = vld [vmem:[%s5182_s22 + $0x6c] ss:$16 sps:$4 sm:$0xff]   ;;  %1997 = vmatpush1.bf16.msra.mxu0 %v4081_v30 }
 0x169   : > { %v5216_v23 = vld [vmem:[%s5198_s30] sm:$0xff]   ;;  %v4054_v36 = vld [vmem:[%s5182_s22 + $0x68] ss:$16 sps:$4 sm:$0xff]   ;;  %1998 = vmatprep.subr.bf16.mxu0 %v4082_v31  ;;  %v4059_v38 = vld [vmem:[%s5182_s22 + $0x8c] ss:$16 sps:$4 sm:$0xff]   ;;  %s5604_s24 = sld [smem:[#allocation43_spill]] }
 0x16a   : > { %v4057_v41 = vld [vmem:[%s5182_s22 + $0x88] ss:$16 sps:$4 sm:$0xff]   ;;  %v4062_v42 = vld [vmem:[%s5182_s22 + $0xac] ss:$16 sps:$4 sm:$0xff]   ;;  %v4166_v4 = vld [vmem:[%s5275_s1 + $0x40] sm:$0xff]   ;;  %vm2418_vm1 = vcmask 261120  }
 0x16b   : > { %1469 = vmatpush1.bf16.msra.mxu1 %v4028_v6  ;;  %v4060_v45 = vld [vmem:[%s5182_s22 + $0xa8] ss:$16 sps:$4 sm:$0xff]   ;;  %v4066_v46 = vld [vmem:[%s5182_s22 + $0xcc] ss:$16 sps:$4 sm:$0xff]   ;;  %v4167_v5 = vld [vmem:[%s5275_s1] sm:$0xff]   ;;  %s5605_s17 = sld [smem:[#allocation45_spill]] }
 0x16c   : > { %1470 = vmatprep.subr.bf16.mxu1 %v4029_v7  ;;  %1999 = vmatpush1.bf16.msra.mxu0 %v4084_v35  ;;  %v4094_v48 = vld [vmem:[%s5138_s10 + $0x84] ss:$8 sps:$4 sm:$0xff]   ;;  %v4064_v49 = vld [vmem:[%s5182_s22 + $0xc8] ss:$16 sps:$4 sm:$0xff]   ;;  %v4097_v52 = vld [vmem:[%s5138_s10 + $0x94] ss:$8 sps:$4 sm:$0xff]  }
 0x16d   : > { %2000 = vmatprep.subr.bf16.mxu0 %v4085_v37  ;;  %v4069_v50 = vld [vmem:[%s5182_s22 + $0xec] ss:$16 sps:$4 sm:$0xff]   ;;  %v4096_v51 = vld [vmem:[%s5138_s10 + $0x80] ss:$8 sps:$4 sm:$0xff]   ;;  %v4099_v54 = vld [vmem:[%s5138_s10 + $0x90] ss:$8 sps:$4 sm:$0xff]  }
 0x16e   : > { %v4067_v53 = vld [vmem:[%s5182_s22 + $0xe8] ss:$16 sps:$4 sm:$0xff]   ;;  %v4100_v55 = vld [vmem:[%s5138_s10 + $0xa4] ss:$8 sps:$4 sm:$0xff]   ;;  %v4103_v57 = vld [vmem:[%s5138_s10 + $0xb4] ss:$8 sps:$4 sm:$0xff]  }
 0x16f   : > { %1471 = vmatpush1.bf16.msra.mxu1 %v4031_v8  ;;  %v4102_v56 = vld [vmem:[%s5138_s10 + $0xa0] ss:$8 sps:$4 sm:$0xff]   ;;  %v4105_v58 = vld [vmem:[%s5138_s10 + $0xb0] ss:$8 sps:$4 sm:$0xff]   ;;  %v4106_v59 = vld [vmem:[%s5138_s10 + $0xc4] ss:$8 sps:$4 sm:$0xff]   ;;  %s1206_s30 = scalar_lea.vmem %s5604_s24, %s5190_s29 }
 0x170   : > { %1472 = vmatprep.subr.bf16.mxu1 %v4032_v9  ;;  %2001 = vmatpush1.bf16.msra.mxu0 %v4087_v39  ;;  %v4108_v60 = vld [vmem:[%s5138_s10 + $0xc0] ss:$8 sps:$4 sm:$0xff]   ;;  %v4109_v61 = vld [vmem:[%s5138_s10 + $0xd4] ss:$8 sps:$4 sm:$0xff]   ;;  %v4111_v62 = vld [vmem:[%s5138_s10 + $0xd0] ss:$8 sps:$4 sm:$0xff]  }
 0x171   : > { %2002 = vmatprep.subr.bf16.mxu0 %v4088_v40  ;;  %v4112_v63 = vld [vmem:[%s5138_s10 + $0xe4] ss:$8 sps:$4 sm:$0xff]   ;;  %v4115_v1 = vld [vmem:[%s5138_s10 + $0xf4] ss:$8 sps:$4 sm:$0xff]   ;;  %v4117_v2 = vld [vmem:[%s5138_s10 + $0xf0] ss:$8 sps:$4 sm:$0xff]   ;;  %s1211_s3 = scalar_lea.vmem %s5605_s17, %s5190_s29 }
 0x172   : > { %v4120_v3 = vld [vmem:[%s5138_s10 + $0x104] ss:$8 sps:$4 sm:$0xff]   ;;  %v1270_v18 = vld [vmem:[%s5130_s12] sm:$0xf]  ;;  %s3749_s12 = sshll.u32 %s5176_s7, 5  ;;  %s5606_s0 = sld [smem:[#allocation47_spill]] }
 0x173   : > { %1473 = vmatpush1.bf16.msra.mxu1 %v4034_v10  ;;  %v4168_v6 = vld [vmem:[%s5275_s1 + $0x48] sm:$0xff]   ;;  %v4170_v8 = vld [vmem:[%s5275_s1 + $0x50] sm:$0xff]   ;;  %v4172_v10 = vld [vmem:[%s5275_s1 + $0x58] sm:$0xff]   ;;  %s1201_s22 = scalar_lea.vmem %s5519_s8, %s3749_s12  ;;  %s5608_s24 = sld [smem:[#allocation48_spill]] }
 0x174   : > { %1474 = vmatprep.subr.bf16.mxu1 %v4035_v11  ;;  %2003 = vmatpush1.bf16.msra.mxu0 %v4090_v43  ;;  %v4169_v7 = vld [vmem:[%s5275_s1 + $0x8] sm:$0xff]   ;;  %v4171_v9 = vld [vmem:[%s5275_s1 + $0x10] sm:$0xff]   ;;  %v4173_v11 = vld [vmem:[%s5275_s1 + $0x18] sm:$0xff]   ;;  %s5609_s25 = sld [smem:[#allocation50_spill]]  ;;  %p3730_p4 = scmp.ne.s32.totalorder %s4804_s2, 0 }
 0x175   : > { %2004 = vmatprep.subr.bf16.mxu0 %v4091_v44  ;;  %vm2906_vm2 = vcmask (!%p3730_p4), 97280   ;;  %vm2909_vm3 = vcmask (!%p3730_p4), 0  }
 0x177   : > { %1475 = vmatpush1.bf16.msra.mxu1 %v4037_v12  ;;  %v4174_v12 = vld [vmem:[%s5275_s1 + $0x60] sm:$0xff]  }
 0x178   : > { %1476 = vmatprep.subr.bf16.mxu1 %v4038_v13  ;;  %2005 = vmatpush1.bf16.msra.mxu0 %v4093_v47  ;;  %v4175_v13 = vld [vmem:[%s5275_s1 + $0x20] sm:$0xff]  }
 0x179   : > { %2006 = vmatprep.subr.bf16.mxu0 %v4094_v48 }
 0x17a   : > { %s1229_s17 = scalar_lea.vmem %s5609_s25, %s5190_s29 }
 0x17b   : > { %1477 = vmatpush1.bf16.msra.mxu1 %v4040_v14  ;;  %v4176_v14 = vld [vmem:[%s5275_s1 + $0x68] sm:$0xff]  }
 0x17c   : > { %1478 = vmatprep.subr.bf16.mxu1 %v4041_v15  ;;  %2007 = vmatpush1.bf16.msra.mxu0 %v4096_v51  ;;  %v1272_v15 = vlaneseq }
 0x17d   : > { %2008 = vmatprep.subr.bf16.mxu0 %v4097_v52 }
 0x17e   : > { %v5288_v16 = vshrl.u32 %v1272_v15, 7  ;;  %v4144_v15 = vld [vmem:[%s5138_s10 + $0x184] ss:$8 sps:$4 sm:$0xff]  }
 0x17f   : > { %1479 = vmatpush1.bf16.msra.mxu1 %v4043_v19 }
 0x180   : > { %1517 = vmatprep.subr.bf16.mxu1 %v4047_v21  ;;  %2009 = vmatpush1.bf16.msra.mxu0 %v4099_v54  ;;  %v1274_v17 = vsub.s32 0, %v5288_v16  ;;  %v1278_v19 = vsub.s32 1, %v5288_v16 }
 0x181   : > { %2010 = vmatprep.subr.bf16.mxu0 %v4100_v55  ;;  %v4129_v55 = vld [vmem:[%s5138_s10 + $0x134] ss:$8 sps:$4 sm:$0xff]  }
 0x182   : > { %1497 = vmatmul.mubr.bf16.vlgmr.msra.gmra.mrb[0].mxu1 %v5216_v23  ;;  %v1275_v20 = vrot.slane %v1270_v18, %v1274_v17  ;;  %v1279_v21 = vrot.slane %v1270_v18, %v1278_v19 }
 0x183   : > { %1518 = vmatpush1.bf16.msra.mxu1 %v4045_v24  ;;  %1506 = vmatprep.mubr.bf16.mxu1 %v4656_v0 }
 0x184   : > { %1519 = vmatprep.subr.bf16.mxu1 %v4050_v25  ;;  %2011 = vmatpush1.bf16.msra.mxu0 %v4102_v56  ;;  %v4127_v56 = vld [vmem:[%s5138_s10 + $0x130] ss:$8 sps:$4 sm:$0xff]  }
 0x185   : > { %2012 = vmatprep.subr.bf16.mxu0 %v4103_v57  ;;  %v4132_v57 = vld [vmem:[%s5138_s10 + $0x144] ss:$8 sps:$4 sm:$0xff]  }
 0x187   : > { %1520 = vmatpush1.bf16.msra.mxu1 %v4048_v28 }
 0x188   : > { %1521 = vmatprep.subr.bf16.mxu1 %v4053_v29  ;;  %2013 = vmatpush1.bf16.msra.mxu0 %v4105_v58  ;;  %v4130_v58 = vld [vmem:[%s5138_s10 + $0x140] ss:$8 sps:$4 sm:$0xff]  }
 0x189   : > { %2014 = vmatprep.subr.bf16.mxu0 %v4106_v59  ;;  %v4135_v59 = vld [vmem:[%s5138_s10 + $0x154] ss:$8 sps:$4 sm:$0xff]  }
 0x18a   : > { %1507 = vmatmul.mubr.bf16.gmra.mrb[4].mxu1 %v5229_v32 }
 0x18b   : > { %1522 = vmatpush1.bf16.msra.mxu1 %v4051_v33  ;;  %1549 = vmatprep.mubr.bf16.mxu1 %v4656_v0 }
 0x18c   : > { %1523 = vmatprep.subr.bf16.mxu1 %v4056_v34  ;;  %2015 = vmatpush1.bf16.msra.mxu0 %v4108_v60  ;;  %v1282_v60 = vsub.s32 2, %v5288_v16 }
 0x18d   : > { %2016 = vmatprep.subr.bf16.mxu0 %v4109_v61  ;;  %v1286_v61 = vsub.s32 3, %v5288_v16 }
 0x18f   : > { %1524 = vmatpush1.bf16.msra.mxu1 %v4054_v36  ;;  %v4118_v36 = vld [vmem:[%s5138_s10 + $0x100] ss:$8 sps:$4 sm:$0xff]  }
 0x190   : > { %1525 = vmatprep.subr.bf16.mxu1 %v4059_v38  ;;  %2017 = vmatpush1.bf16.msra.mxu0 %v4111_v62  ;;  %v4123_v38 = vld [vmem:[%s5138_s10 + $0x114] ss:$8 sps:$4 sm:$0xff]   ;;  %v4133_v62 = vld [vmem:[%s5138_s10 + $0x150] ss:$8 sps:$4 sm:$0xff]  }
 0x191   : > { %2018 = vmatprep.subr.bf16.mxu0 %v4112_v63  ;;  %v4138_v63 = vld [vmem:[%s5138_s10 + $0x164] ss:$8 sps:$4 sm:$0xff]  }
 0x193   : > { %1526 = vmatpush1.bf16.msra.mxu1 %v4057_v41 }
 0x194   : > { %1527 = vmatprep.subr.bf16.mxu1 %v4062_v42 }
 0x197   : > { %1528 = vmatpush1.bf16.msra.mxu1 %v4060_v45 }
 0x198   : > { %1529 = vmatprep.subr.bf16.mxu1 %v4066_v46  ;;  %v4121_v46 = vld [vmem:[%s5138_s10 + $0x110] ss:$8 sps:$4 sm:$0xff]  }
 0x19b   : > { %1530 = vmatpush1.bf16.msra.mxu1 %v4064_v49  ;;  %v4126_v49 = vld [vmem:[%s5138_s10 + $0x124] ss:$8 sps:$4 sm:$0xff]  }
 0x19c   : > { %1531 = vmatprep.subr.bf16.mxu1 %v4069_v50 }
 0x19f   : > { %1532 = vmatpush1.bf16.msra.mxu1 %v4067_v53  ;;  %v4124_v53 = vld [vmem:[%s5138_s10 + $0x120] ss:$8 sps:$4 sm:$0xff]  }
 0x1a0   : > { %3755 = vmatprep.subr.bf16.mxu1 %v4166_v4  ;;  %v4141_v4 = vld [vmem:[%s5138_s10 + $0x174] ss:$8 sps:$4 sm:$0xff]  }
 0x1a2   : > { %1550 = vmatmul.mubr.bf16.vlgmr.msra.gmra.mrb[8].mxu1 %v5216_v23 }
 0x1a3   : > { %1559 = vmatprep.mubr.bf16.mxu1 %v4656_v0  ;;  %v4114_v0 = vld [vmem:[%s5138_s10 + $0xe0] ss:$8 sps:$4 sm:$0xff]   ;;  %3756 = vmatpush3.bf16.msra.mxu1 %v4167_v5 }
 0x1a4   : > { %2019 = vmatpush1.bf16.msra.mxu0 %v4114_v0  ;;  %3757 = vmatprep.subr.bf16.mxu1 %v4168_v6  ;;  %v1283_v0 = vrot.slane %v1270_v18, %v1282_v60 }
 0x1a5   : > { %2020 = vmatprep.subr.bf16.mxu0 %v4115_v1  ;;  %v1287_v1 = vrot.slane %v1270_v18, %v1286_v61 }
 0x1a7   : > { %3758 = vmatpush3.bf16.msra.mxu1 %v4169_v7 }
 0x1a8   : > { %2021 = vmatpush1.bf16.msra.mxu0 %v4117_v2  ;;  %3759 = vmatprep.subr.bf16.mxu1 %v4170_v8  ;;  %v4136_v2 = vld [vmem:[%s5138_s10 + $0x160] ss:$8 sps:$4 sm:$0xff]  }
 0x1a9   : > { %2043 = vmatprep.subr.bf16.mxu0 %v4120_v3 }
 0x1aa   : > { %1560 = vmatmul.mubr.bf16.gmra.mrb[12].mxu1 %v5229_v32 }
 0x1ab   : > { %3760 = vmatpush3.bf16.msra.mxu1 %v4171_v9 }
 0x1ac   : > { %3761 = vmatprep.subr.bf16.mxu1 %v4172_v10 }
 0x1af   : > { %3762 = vmatpush3.bf16.msra.mxu1 %v4173_v11 }
 0x1b0   : > { %3763 = vmatprep.subr.bf16.mxu1 %v4174_v12  ;;  %v4139_v12 = vld [vmem:[%s5138_s10 + $0x170] ss:$8 sps:$4 sm:$0xff]  }
 0x1b3   : > { %3764 = vmatpush3.bf16.msra.mxu1 %v4175_v13 }
 0x1b4   : > { %3765 = vmatprep.subr.bf16.mxu1 %v4176_v14 }
 0x255   : > { %v1498_v22 = vpop.f32.mrb[0].mxu1 }
 0x256   : > { %v1499_v23 = vadd.f32 %v1498_v22, %v1275_v20  ;;  %v1500_v24 = vpop.f32.mrb[1].mxu1  ;;  %v4142_v22 = vld [vmem:[%s5138_s10 + $0x180] ss:$8 sps:$4 sm:$0xff]  }
 0x257   : > { %v1501_v25 = vadd.f32 %v1500_v24, %v1279_v21  ;;  %v1502_v26 = vpop.f32.mrb[2].mxu1 }
 0x258   : > { %v1503_v27 = vadd.f32 %v1502_v26, %v1275_v20  ;;  %v1504_v28 = vpop.f32.mrb[3].mxu1  ;;  %v1570_v30 = vmax.f32 %v1499_v23, 0.0 }
 0x259   : > { %v1505_v29 = vadd.f32 %v1504_v28, %v1279_v21  ;;  %v1571_v32 = vmax.f32 %v1501_v25, 0.0  ;;  %v4147_v25 = vld [vmem:[%s5138_s10 + $0x194] ss:$8 sps:$4 sm:$0xff]  }
 0x25a   : > { %v1574_v31 = vmax.f32 %v1503_v27, 0.0 }
 0x25b   : > { %v1575_v33 = vmax.f32 %v1505_v29, 0.0 }
 0x25c   : > { %v1586_v34 = vpack.c.bf16 %v1574_v31, %v1570_v30 }
 0x25d   : > { %v1587_v35 = vpack.c.bf16 %v1575_v33, %v1571_v32  ;;  %v1508_v37 = vpop.f32.mrb[4].mxu1  ;;  %v4145_v33 = vld [vmem:[%s5138_s10 + $0x190] ss:$8 sps:$4 sm:$0xff]  }
 0x25e   : > { %v1509_v39 = vadd.f32 %v1508_v37, %v1275_v20  ;;  %v1510_v40 = vpop.f32.mrb[5].mxu1 }
 0x25f   : > { %2022 = vmatprep.mubr.bf16.mxu0 %v1587_v35  ;;  %v1511_v41 = vadd.f32 %v1510_v40, %v1279_v21  ;;  %v1512_v42 = vpop.f32.mrb[6].mxu1  ;;  %v4148_v40 = vld [vmem:[%s5138_s10 + $0x1a0] ss:$8 sps:$4 sm:$0xff]  }
 0x260   : > { %2023 = vmatmul.mubr.bf16.vlgmr.msra.gmra.mrb[0].mxu0 %v1586_v34  ;;  %v1578_v43 = vmax.f32 %v1509_v39, 0.0  ;;  %v1513_v44 = vadd.f32 %v1512_v42, %v1275_v20  ;;  %v1514_v45 = vpop.f32.mrb[7].mxu1  ;;  %v4153_v42 = vld [vmem:[%s5138_s10 + $0x1b4] ss:$8 sps:$4 sm:$0xff]  }
 0x261   : > { %2044 = vmatpush1.bf16.msra.mxu0 %v4118_v36  ;;  %v1579_v47 = vmax.f32 %v1511_v41, 0.0  ;;  %v1515_v48 = vadd.f32 %v1514_v45, %v1279_v21  ;;  %v4150_v36 = vld [vmem:[%s5138_s10 + $0x1a4] ss:$8 sps:$4 sm:$0xff]   ;;  %v4154_v45 = vld [vmem:[%s5138_s10 + $0x1c0] ss:$8 sps:$4 sm:$0xff]  }
 0x262   : > { %2045 = vmatprep.subr.bf16.mxu0 %v4123_v38  ;;  %v1582_v50 = vmax.f32 %v1513_v44, 0.0  ;;  %v4156_v44 = vld [vmem:[%s5138_s10 + $0x1c4] ss:$8 sps:$4 sm:$0xff]  }
 0x263   : > { %v1583_v51 = vmax.f32 %v1515_v48, 0.0  ;;  %v4162_v48 = vld [vmem:[%s5138_s10 + $0x1e4] ss:$8 sps:$4 sm:$0xff]  }
 0x264   : > { %v1590_v52 = vpack.c.bf16 %v1582_v50, %v1578_v43  ;;  %v4151_v43 = vld [vmem:[%s5138_s10 + $0x1b0] ss:$8 sps:$4 sm:$0xff]   ;;  %v4165_v50 = vld [vmem:[%s5138_s10 + $0x1f4] ss:$8 sps:$4 sm:$0xff]  }
 0x265   : > { %2046 = vmatpush1.bf16.msra.mxu0 %v4121_v46  ;;  %v1591_v54 = vpack.c.bf16 %v1583_v51, %v1579_v47  ;;  %v4159_v46 = vld [vmem:[%s5138_s10 + $0x1d4] ss:$8 sps:$4 sm:$0xff]   ;;  %v4157_v47 = vld [vmem:[%s5138_s10 + $0x1d0] ss:$8 sps:$4 sm:$0xff]  }
 0x266   : > { %2047 = vmatprep.subr.bf16.mxu0 %v4126_v49  ;;  %v4160_v49 = vld [vmem:[%s5138_s10 + $0x1e0] ss:$8 sps:$4 sm:$0xff]   ;;  %v4163_v51 = vld [vmem:[%s5138_s10 + $0x1f0] ss:$8 sps:$4 sm:$0xff]  }
 0x267   : > { %2032 = vmatprep.mubr.bf16.mxu0 %v1591_v54  ;;  %v4179_v54 = vld [vmem:[%s5275_s1 + $0x30] sm:$0xff]  }
 0x268   : > { %2033 = vmatmul.mubr.bf16.gmra.mrb[4].mxu0 %v1590_v52  ;;  %v4177_v52 = vld [vmem:[%s5275_s1 + $0x28] sm:$0xff]  }
 0x269   : > { %2048 = vmatpush1.bf16.msra.mxu0 %v4124_v53  ;;  %3766 = vmatpush3.bf16.msra.mxu1 %v4177_v52  ;;  %v4178_v53 = vld [vmem:[%s5275_s1 + $0x70] sm:$0xff]   ;;  %v4187_v52 = vld [vmem:[%s1206_s30 + $0x8] sm:$0xff]  }
 0x26a   : > { %2049 = vmatprep.subr.bf16.mxu0 %v4129_v55  ;;  %3767 = vmatprep.subr.bf16.mxu1 %v4178_v53  ;;  %v4180_v55 = vld [vmem:[%s5275_s1 + $0x78] sm:$0xff]  }
 0x26d   : > { %2050 = vmatpush1.bf16.msra.mxu0 %v4127_v56  ;;  %3768 = vmatpush3.bf16.msra.mxu1 %v4179_v54  ;;  %v4181_v56 = vld [vmem:[%s5275_s1 + $0x38] sm:$0xff]   ;;  %v3693_v54 = vld [vmem:[%s993_s23] ss:$0 sm:$0xff]  ;;  %s1219_s1 = scalar_lea.vmem %s5606_s0, %s5190_s29 }
 0x26e   : > { %2051 = vmatprep.subr.bf16.mxu0 %v4132_v57  ;;  %3769 = vmatprep.subr.bf16.mxu1 %v4180_v55  ;;  %v1658_v57 = vld [vmem:[%s5145_s4] sm:$0x3]  ;;  %s5607_s4 = sld [smem:[#allocation46_spill]] }
 0x271   : > { %2052 = vmatpush1.bf16.msra.mxu0 %v4130_v58  ;;  %3770 = vmatpush3.bf16.msra.mxu1 %v4181_v56  ;;  %v1663_v58 = vrot.slane %v1658_v57, %v1274_v17 }
 0x272   : > { %2053 = vmatprep.subr.bf16.mxu0 %v4135_v59  ;;  %v1667_v59 = vrot.slane %v1658_v57, %v1278_v19 }
 0x275   : > { %2054 = vmatpush1.bf16.msra.mxu0 %v4133_v62  ;;  %v1551_v3 = vpop.f32.mrb[8].mxu1 }
 0x276   : > { %2055 = vmatprep.subr.bf16.mxu0 %v4138_v63  ;;  %v1552_v5 = vadd.f32 %v1551_v3, %v1283_v0  ;;  %v1553_v6 = vpop.f32.mrb[9].mxu1 }
 0x277   : > { %v1554_v7 = vadd.f32 %v1553_v6, %v1287_v1  ;;  %v1555_v8 = vpop.f32.mrb[10].mxu1 }
 0x278   : > { %v1572_v9 = vmax.f32 %v1552_v5, 0.0  ;;  %v1556_v10 = vadd.f32 %v1555_v8, %v1283_v0  ;;  %v1557_v11 = vpop.f32.mrb[11].mxu1 }
 0x279   : > { %2056 = vmatpush1.bf16.msra.mxu0 %v4136_v2  ;;  %v1573_v13 = vmax.f32 %v1554_v7, 0.0  ;;  %v1558_v14 = vadd.f32 %v1557_v11, %v1287_v1 }
 0x27a   : > { %2057 = vmatprep.subr.bf16.mxu0 %v4141_v4  ;;  %v1576_v18 = vmax.f32 %v1556_v10, 0.0 }
 0x27b   : > { %v1577_v20 = vmax.f32 %v1558_v14, 0.0 }
 0x27c   : > { %v1588_v21 = vpack.c.bf16 %v1576_v18, %v1572_v9 }
 0x27d   : > { %2058 = vmatpush1.bf16.msra.mxu0 %v4139_v12  ;;  %v1589_v23 = vpack.c.bf16 %v1577_v20, %v1573_v13  ;;  %v1561_v24 = vpop.f32.mrb[12].mxu1 }
 0x27e   : > { %2059 = vmatprep.subr.bf16.mxu0 %v4144_v15  ;;  %v1562_v26 = vadd.f32 %v1561_v24, %v1283_v0  ;;  %v1563_v27 = vpop.f32.mrb[13].mxu1  ;;  %v4182_v24 = vld [vmem:[%s1201_s22] sm:$0xff]  }
 0x27f   : > { %v1564_v28 = vadd.f32 %v1563_v27, %v1287_v1  ;;  %v1565_v29 = vpop.f32.mrb[14].mxu1  ;;  %2075 = vmatprep.mubr.bf16.mxu0 %v1589_v23  ;;  %v4185_v27 = vld [vmem:[%s1201_s22 + $0x18] sm:$0xff]  }
 0x280   : > { %v1580_v30 = vmax.f32 %v1562_v26, 0.0  ;;  %v1566_v31 = vadd.f32 %v1565_v29, %v1283_v0  ;;  %v1567_v32 = vpop.f32.mrb[15].mxu1  ;;  %v4184_v26 = vld [vmem:[%s1201_s22 + $0x10] sm:$0xff]  }
 0x281   : > { %2060 = vmatpush1.bf16.msra.mxu0 %v4142_v22  ;;  %v1581_v34 = vmax.f32 %v1564_v28, 0.0  ;;  %v1568_v35 = vadd.f32 %v1567_v32, %v1287_v1  ;;  %v4186_v28 = vld [vmem:[%s1206_s30] sm:$0xff]   ;;  %s1224_s30 = scalar_lea.vmem %s5608_s24, %s5190_s29 }
 0x282   : > { %2061 = vmatprep.subr.bf16.mxu0 %v4147_v25  ;;  %v1584_v37 = vmax.f32 %v1566_v31, 0.0  ;;  %v4183_v25 = vld [vmem:[%s1201_s22 + $0x8] sm:$0xff]   ;;  %3829 = vmatprep.subr.bf16.mxu1 %v4186_v28  ;;  %s1214_s22 = scalar_lea.vmem %s5607_s4, %s5176_s7 }
 0x283   : > { %v1585_v38 = vmax.f32 %v1568_v35, 0.0 }
 0x284   : > { %v1592_v39 = vpack.c.bf16 %v1584_v37, %v1580_v30  ;;  %v3676_v30 = vld [vmem:[%s985_s26] ss:$0 sm:$0xff] }
 0x285   : > { %2062 = vmatpush1.bf16.msra.mxu0 %v4145_v33  ;;  %v1593_v41 = vpack.c.bf16 %v1585_v38, %v1581_v34 }
 0x286   : > { %2063 = vmatprep.subr.bf16.mxu0 %v4150_v36 }
 0x289   : > { %2064 = vmatpush1.bf16.msra.mxu0 %v4148_v40 }
 0x28a   : > { %2065 = vmatprep.subr.bf16.mxu0 %v4153_v42 }
 0x28d   : > { %2066 = vmatpush1.bf16.msra.mxu0 %v4151_v43 }
 0x28e   : > { %2067 = vmatprep.subr.bf16.mxu0 %v4156_v44 }
 0x291   : > { %2068 = vmatpush1.bf16.msra.mxu0 %v4154_v45 }
 0x292   : > { %2069 = vmatprep.subr.bf16.mxu0 %v4159_v46 }
 0x295   : > { %2070 = vmatpush1.bf16.msra.mxu0 %v4157_v47 }
 0x296   : > { %2071 = vmatprep.subr.bf16.mxu0 %v4162_v48 }
 0x299   : > { %2072 = vmatpush1.bf16.msra.mxu0 %v4160_v49 }
 0x29a   : > { %2073 = vmatprep.subr.bf16.mxu0 %v4165_v50 }
 0x29d   : > { %2074 = vmatpush1.bf16.msra.mxu0 %v4163_v51 }
 0x29e   : > { %3817 = vmatprep.subr.bf16.mxu0 %v4182_v24 }
 0x2a0   : > { %2076 = vmatmul.mubr.bf16.vlgmr.msra.gmra.mrb[0].mxu0 %v1588_v21 }
 0x2a1   : > { %2085 = vmatprep.mubr.bf16.mxu0 %v1593_v41  ;;  %3818 = vmatpush3.bf16.msra.mxu0 %v4182_v24 }
 0x2a2   : > { %3819 = vmatprep.subr.bf16.mxu0 %v4183_v25 }
 0x2a5   : > { %3820 = vmatpush3.bf16.msra.mxu0 %v4183_v25 }
 0x2a6   : > { %3821 = vmatprep.subr.bf16.mxu0 %v4184_v26 }
 0x2a8   : > { %2086 = vmatmul.mubr.bf16.gmra.mrb[4].mxu0 %v1592_v39 }
 0x2a9   : > { %3822 = vmatpush3.bf16.msra.mxu0 %v4184_v26 }
 0x2aa   : > { %3823 = vmatprep.subr.bf16.mxu0 %v4185_v27 }
 0x2ad   : > { %3824 = vmatpush3.bf16.msra.mxu0 %v4185_v27 }
 0x373   : > { %v2077_v60 = vpop.f32.mrb[0].mxu0 }
 0x374   : > { %v3890_v61 = vadd.f32 %v2077_v60, %v1663_v58  ;;  %v2079_v62 = vpop.f32.mrb[1].mxu0 }
 0x375   : > { %v3891_v63 = vadd.f32 %v2079_v62, %v1667_v59  ;;  %v2081_v0 = vpop.f32.mrb[2].mxu0 }
 0x376   : > { %v3892_v1 = vadd.f32 %v2081_v0, %v1663_v58  ;;  %v2083_v2 = vpop.f32.mrb[3].mxu0  ;;  %v2096_v4 = vmax.f32 %v3890_v61, 0.0  ;;  %v4188_v0 = vld [vmem:[%s1211_s3] sm:$0xff]  }
 0x377   : > { %v3893_v3 = vadd.f32 %v2083_v2, %v1667_v59  ;;  %v2097_v6 = vmax.f32 %v3891_v63, 0.0  ;;  %v3700_v2 = vld [vmem:[%s1001_s28] ss:$0 sm:$0xff] }
 0x378   : > { %v2098_v5 = vmax.f32 %v3892_v1, 0.0  ;;  %v4189_v1 = vld [vmem:[%s1211_s3 + $0x8] sm:$0xff]  }
 0x379   : > { %v2099_v7 = vmax.f32 %v3893_v3, 0.0 }
 0x37a   : > { %v2104_v8 = vpack.c.bf16 %v2098_v5, %v2096_v4 }
 0x37b   : > { %v2105_v9 = vpack.c.bf16 %v2099_v7, %v2097_v6  ;;  %v2087_v10 = vpop.f32.mrb[4].mxu0 }
 0x37c   : > { %v3894_v11 = vadd.f32 %v2087_v10, %v1663_v58  ;;  %v2089_v17 = vpop.f32.mrb[5].mxu0 }
 0x37d   : > { %v3895_v16 = vadd.f32 %v2089_v17, %v1667_v59  ;;  %v2091_v19 = vpop.f32.mrb[6].mxu0  ;;  %2275 = vmatprep.mubr.bf16.mxu1 %v2105_v9 }
 0x37e   : > { %v3896_v12 = vadd.f32 %v2091_v19, %v1663_v58  ;;  %v2093_v13 = vpop.f32.mrb[7].mxu0  ;;  %2276 = vmatmul.mubr.bf16.vlgmr.msra.gmra.mrb[16].mxu1 %v2104_v8  ;;  %v2100_v15 = vmax.f32 %v3894_v11, 0.0 }
 0x37f   : > { %v3897_v14 = vadd.f32 %v2093_v13, %v1667_v59  ;;  %v2101_v20 = vmax.f32 %v3895_v16, 0.0  ;;  %3830 = vmatpush3.bf16.msra.mxu1 %v4186_v28 }
 0x380   : > { %v2102_v18 = vmax.f32 %v3896_v12, 0.0  ;;  %3831 = vmatprep.subr.bf16.mxu1 %v4187_v52 }
 0x381   : > { %v2103_v21 = vmax.f32 %v3897_v14, 0.0  ;;  %v4190_v14 = vld [vmem:[%s1219_s1] sm:$0xff]  }
 0x382   : > { %v2106_v22 = vpack.c.bf16 %v2102_v18, %v2100_v15  ;;  %v4191_v15 = vld [vmem:[%s1219_s1 + $0x8] sm:$0xff]   ;;  %v3705_v18 = vld [vmem:[%s1214_s22] ss:$0 sm:$0xff] }
 0x383   : > { %v2107_v23 = vpack.c.bf16 %v2103_v21, %v2101_v20  ;;  %3832 = vmatpush3.bf16.msra.mxu1 %v4187_v52  ;;  %v4195_v52 = vld [vmem:[%s1229_s17 + $0x8] sm:$0xff]  }
 0x384   : > { %3837 = vmatprep.subr.bf16.mxu1 %v4188_v0 }
 0x385   : > { %2283 = vmatprep.mubr.bf16.mxu1 %v2107_v23 }
 0x386   : > { %2284 = vmatmul.mubr.bf16.gmra.mrb[20].mxu1 %v2106_v22 }
 0x451   : > { %v3771_v29 = vpop.f32.mrb[16].mxu1 }
 0x452   : > { %v3772_v31 = vpop.f32.mrb[17].mxu1 }
 0x453   : > { %v3773_v32 = vadd.f32 %v3772_v31, %v3771_v29  ;;  %v3774_v33 = vpop.f32.mrb[18].mxu1 }
 0x454   : > { %v3775_v34 = vpop.f32.mrb[19].mxu1 }
 0x455   : > { %v2278_v35 = vadd.f32 %v3773_v32, %v3676_v30  ;;  %v3776_v36 = vadd.f32 %v3775_v34, %v3774_v33  ;;  %v4192_v34 = vld [vmem:[%s1224_s30] sm:$0xff]  }
 0x457   : > { %v2281_v37 = vadd.f32 %v3776_v36, %v3676_v30  ;;  %v2292_v38 = vmax.f32 %v2278_v35, 0.0  ;;  %v4193_v35 = vld [vmem:[%s1224_s30 + $0x8] sm:$0xff]   ;;  %v3710_v36 = vld [vmem:[%s1009_s11] ss:$0 sm:$0xff] }
 0x459   : > { %v2293_v39 = vmax.f32 %v2281_v37, 0.0  ;;  %v3777_v40 = vpop.f32.mrb[20].mxu1 }
 0x45a   : > { %v3778_v41 = vpop.f32.mrb[21].mxu1 }
 0x45b   : > { %v2296_v42 = vpack.c.bf16 %v2293_v39, %v2292_v38  ;;  %v3779_v43 = vadd.f32 %v3778_v41, %v3777_v40  ;;  %v3780_v44 = vpop.f32.mrb[22].mxu1 }
 0x45c   : > { %v3781_v45 = vpop.f32.mrb[23].mxu1 }
 0x45d   : > { %v2286_v46 = vadd.f32 %v3779_v43, %v3676_v30  ;;  %v3782_v47 = vadd.f32 %v3781_v45, %v3780_v44  ;;  %3825 = vmatprep.mubr.msk.bf16.mxu0 %vm2337_vm0, %v2296_v42 }
 0x45f   : > { %v2289_v48 = vadd.f32 %v3782_v47, %v3676_v30  ;;  %v2294_v49 = vmax.f32 %v2286_v46, 0.0 }
 0x461   : > { %v2295_v50 = vmax.f32 %v2289_v48, 0.0 }
 0x463   : > { %v2297_v51 = vpack.c.bf16 %v2295_v50, %v2294_v49 }
 0x465   : > { %3826 = vmatmul.mubr.msk.bf16.vlgmr.msra.gmra.mrb[8].mxu0 %vm2337_vm0, %v2297_v51  ;;  %v4194_v51 = vld [vmem:[%s1229_s17] sm:$0xff]  }
 0x538   : > { %v3827_v53 = vpop.f32.mrb[8].mxu0 }
 0x539   : > { %v2378_v55 = vpop.f32.mrb[9].mxu0  ;;  %v2387_v61 = vadd.f32 %v3827_v53, %v3693_v54  ;;  %v3715_v53 = vld [vmem:[%s1017_s6] ss:$0 sm:$0xff] }
 0x53a   : > { %v3828_v56 = vpop.f32.mrb[10].mxu0  ;;  %v2379_v59 = vadd.f32 %v3693_v54, %v2378_v55 }
 0x53b   : > { %v2390_v57 = vadd.f32 %v3828_v56, %v3693_v54  ;;  %v2381_v58 = vpop.f32.mrb[11].mxu0 }
 0x53c   : > { %v2382_v60 = vadd.f32 %v3693_v54, %v2381_v58 }
 0x53d   : > { %v2394_v63 = vpack.c.bf16 %v2390_v57, %v2387_v61 }
 0x53e   : > { %v2393_v62 = vpack.c.bf16 %v2382_v60, %v2379_v59 }
 0x540   : > { %3833 = vmatprep.mubr.msk.bf16.mxu1 %vm2418_vm1, %v2393_v62 }
 0x541   : > { %3834 = vmatmul.mubr.msk.bf16.vlgmr.msra.gmra.mrb[24].mxu1 %vm2418_vm1, %v2394_v63 }
 0x542   : > { %3838 = vmatpush3.bf16.msra.mxu1 %v4188_v0 }
 0x543   : > { %3839 = vmatprep.subr.bf16.mxu1 %v4189_v1 }
 0x546   : > { %3840 = vmatpush3.bf16.msra.mxu1 %v4189_v1 }
 0x547   : > { %3845 = vmatprep.subr.bf16.mxu1 %v4190_v14 }
 0x614   : > { %v3835_v3 = vpop.f32.mrb[24].mxu1 }
 0x615   : > { %v2468_v4 = vadd.f32 %v3835_v3, %v3700_v2  ;;  %v2459_v5 = vpop.f32.mrb[25].mxu1 }
 0x616   : > { %v2460_v6 = vadd.f32 %v3700_v2, %v2459_v5  ;;  %v3836_v7 = vpop.f32.mrb[26].mxu1  ;;  %v4197_v5 = vld [vmem:[%s5167_s13 + $0x8] sm:$0xff]  }
 0x617   : > { %v2471_v8 = vadd.f32 %v3836_v7, %v3700_v2  ;;  %v2462_v9 = vpop.f32.mrb[27].mxu1  ;;  %v2476_v11 = vmax.f32 %v2468_v4, 0.0  ;;  %v4196_v4 = vld [vmem:[%s5167_s13] sm:$0xff]  }
 0x618   : > { %v2463_v10 = vadd.f32 %v3700_v2, %v2462_v9  ;;  %v2474_v16 = vmax.f32 %v2460_v6, 0.0  ;;  %v3720_v6 = vld [vmem:[%s1025_s27] ss:$0 sm:$0xff]  ;;  %s5610_s27 = sld [smem:[#allocation51_spill]] }
 0x619   : > { %v2477_v17 = vmax.f32 %v2471_v8, 0.0 }
 0x61a   : > { %v2475_v19 = vmax.f32 %v2463_v10, 0.0 }
 0x61b   : > { %v2479_v12 = vpack.c.bf16 %v2477_v17, %v2476_v11 }
 0x61c   : > { %v2478_v13 = vpack.c.bf16 %v2475_v19, %v2474_v16 }
 0x61e   : > { %3841 = vmatprep.mubr.msk.bf16.mxu1 %vm2418_vm1, %v2478_v13  ;;  %s1232_s13 = scalar_lea.vmem %s5610_s27, %s5176_s7 }
 0x61f   : > { %3842 = vmatmul.mubr.msk.bf16.vlgmr.msra.gmra.mrb[28].mxu1 %vm2418_vm1, %v2479_v12 }
 0x620   : > { %3846 = vmatpush3.bf16.msra.mxu1 %v4190_v14 }
 0x621   : > { %3847 = vmatprep.subr.bf16.mxu1 %v4191_v15 }
 0x624   : > { %3848 = vmatpush3.bf16.msra.mxu1 %v4191_v15 }
 0x625   : > { %3853 = vmatprep.subr.bf16.mxu1 %v4192_v34 }
 0x6f2   : > { %v3843_v20 = vpop.f32.mrb[28].mxu1 }
 0x6f3   : > { %v2543_v21 = vpop.f32.mrb[29].mxu1  ;;  %v2552_v24 = vadd.f32 %v3843_v20, %v3705_v18 }
 0x6f4   : > { %v2544_v22 = vadd.f32 %v3705_v18, %v2543_v21  ;;  %v3844_v23 = vpop.f32.mrb[30].mxu1  ;;  %v3725_v21 = vld [vmem:[%s1232_s13] ss:$0 sm:$0xff] }
 0x6f5   : > { %v2555_v25 = vadd.f32 %v3844_v23, %v3705_v18  ;;  %v2546_v26 = vpop.f32.mrb[31].mxu1  ;;  %v2560_v31 = vadd.f32 %v2552_v24, %v2387_v61 }
 0x6f6   : > { %v2547_v27 = vadd.f32 %v3705_v18, %v2546_v26  ;;  %v2558_v29 = vadd.f32 %v2544_v22, %v2379_v59 }
 0x6f7   : > { %v2561_v28 = vadd.f32 %v2555_v25, %v2390_v57 }
 0x6f8   : > { %v2559_v30 = vadd.f32 %v2547_v27, %v2382_v60 }
 0x6f9   : > { %v2563_v33 = vpack.c.bf16 %v2561_v28, %v2560_v31 }
 0x6fa   : > { %v2562_v32 = vpack.c.bf16 %v2559_v30, %v2558_v29 }
 0x6fc   : > { %3849 = vmatprep.mubr.msk.bf16.mxu1 %vm2418_vm1, %v2562_v32 }
 0x6fd   : > { %3850 = vmatmul.mubr.msk.bf16.vlgmr.msra.gmra.mrb[32].mxu1 %vm2418_vm1, %v2563_v33 }
 0x6fe   : > { %3854 = vmatpush3.bf16.msra.mxu1 %v4192_v34  ;;  %v4657_v34 = vmov (!%p3730_p4), 0.0  }
 0x6ff   : > { %3855 = vmatprep.subr.bf16.mxu1 %v4193_v35  ;;  %2907 = vst.msk [vmem:[#allocation21] sm:$0xff] (!%p3730_p4), %vm2906_vm2, %v4657_v34  ;;  %2908 = vst.msk [vmem:[#allocation21 + $0x8] sm:$0xff] (!%p3730_p4), %vm2906_vm2, %v4657_v34 }
 0x700   : > { %2910 = vst.msk [vmem:[#allocation22] sm:$0x1] (!%p3730_p4), %vm2909_vm3, %v4657_v34 }
 0x702   : > { %3856 = vmatpush3.bf16.msra.mxu1 %v4193_v35 }
 0x703   : > { %3861 = vmatprep.subr.bf16.mxu1 %v4194_v51 }
 0x7d0   : > { %v3851_v37 = vpop.f32.mrb[32].mxu1 }
 0x7d1   : > { %v2636_v38 = vadd.f32 %v3851_v37, %v3710_v36  ;;  %v2627_v39 = vpop.f32.mrb[33].mxu1 }
 0x7d2   : > { %v2628_v40 = vadd.f32 %v3710_v36, %v2627_v39  ;;  %v3852_v41 = vpop.f32.mrb[34].mxu1 }
 0x7d3   : > { %v2639_v42 = vadd.f32 %v3852_v41, %v3710_v36  ;;  %v2630_v43 = vpop.f32.mrb[35].mxu1  ;;  %v2644_v45 = vmax.f32 %v2636_v38, 0.0 }
 0x7d4   : > { %v2631_v44 = vadd.f32 %v3710_v36, %v2630_v43  ;;  %v2642_v47 = vmax.f32 %v2628_v40, 0.0 }
 0x7d5   : > { %v2645_v46 = vmax.f32 %v2639_v42, 0.0 }
 0x7d6   : > { %v2643_v48 = vmax.f32 %v2631_v44, 0.0 }
 0x7d7   : > { %v2647_v49 = vpack.c.bf16 %v2645_v46, %v2644_v45 }
 0x7d8   : > { %v2646_v50 = vpack.c.bf16 %v2643_v48, %v2642_v47 }
 0x7da   : > { %3857 = vmatprep.mubr.msk.bf16.mxu1 %vm2418_vm1, %v2646_v50 }
 0x7db   : > { %3858 = vmatmul.mubr.msk.bf16.vlgmr.msra.gmra.mrb[36].mxu1 %vm2418_vm1, %v2647_v49 }
 0x7dc   : > { %3862 = vmatpush3.bf16.msra.mxu1 %v4194_v51 }
 0x7dd   : > { %3863 = vmatprep.subr.bf16.mxu1 %v4195_v52 }
 0x7e0   : > { %3864 = vmatpush3.bf16.msra.mxu1 %v4195_v52 }
 0x7e1   : > { %3869 = vmatprep.subr.bf16.mxu1 %v4196_v4 }
 0x8ae   : > { %v3859_v54 = vpop.f32.mrb[36].mxu1 }
 0x8af   : > { %v2711_v55 = vpop.f32.mrb[37].mxu1  ;;  %v2720_v58 = vadd.f32 %v3859_v54, %v3715_v53 }
 0x8b0   : > { %v2712_v56 = vadd.f32 %v3715_v53, %v2711_v55  ;;  %v3860_v57 = vpop.f32.mrb[38].mxu1 }
 0x8b1   : > { %v2723_v59 = vadd.f32 %v3860_v57, %v3715_v53  ;;  %v2714_v60 = vpop.f32.mrb[39].mxu1  ;;  %v2728_v1 = vadd.f32 %v2720_v58, %v2560_v31 }
 0x8b2   : > { %v2715_v61 = vadd.f32 %v3715_v53, %v2714_v60  ;;  %v2726_v63 = vadd.f32 %v2712_v56, %v2558_v29 }
 0x8b3   : > { %v2729_v62 = vadd.f32 %v2723_v59, %v2561_v28 }
 0x8b4   : > { %v2727_v0 = vadd.f32 %v2715_v61, %v2559_v30 }
 0x8b5   : > { %v2731_v3 = vpack.c.bf16 %v2729_v62, %v2728_v1 }
 0x8b6   : > { %v2730_v2 = vpack.c.bf16 %v2727_v0, %v2726_v63 }
 0x8b8   : > { %3865 = vmatprep.mubr.msk.bf16.mxu1 %vm2418_vm1, %v2730_v2 }
 0x8b9   : > { %3866 = vmatmul.mubr.msk.bf16.vlgmr.msra.gmra.mrb[40].mxu1 %vm2418_vm1, %v2731_v3 }
 0x8ba   : > { %3870 = vmatpush3.bf16.msra.mxu1 %v4196_v4 }
 0x8bb   : > { %3871 = vmatprep.subr.bf16.mxu1 %v4197_v5 }
 0x8be   : > { %3872 = vmatpush3.bf16.msra.mxu1 %v4197_v5 }
 0x98c   : > { %v3867_v7 = vpop.f32.mrb[40].mxu1 }
 0x98d   : > { %v2804_v8 = vadd.f32 %v3867_v7, %v3720_v6  ;;  %v2795_v9 = vpop.f32.mrb[41].mxu1 }
 0x98e   : > { %v2796_v10 = vadd.f32 %v3720_v6, %v2795_v9  ;;  %v3868_v11 = vpop.f32.mrb[42].mxu1 }
 0x98f   : > { %v2807_v17 = vadd.f32 %v3868_v11, %v3720_v6  ;;  %v2798_v16 = vpop.f32.mrb[43].mxu1  ;;  %v2812_v12 = vmax.f32 %v2804_v8, 0.0 }
 0x990   : > { %v2799_v19 = vadd.f32 %v3720_v6, %v2798_v16  ;;  %v2810_v14 = vmax.f32 %v2796_v10, 0.0 }
 0x991   : > { %v2813_v13 = vmax.f32 %v2807_v17, 0.0 }
 0x992   : > { %v2811_v15 = vmax.f32 %v2799_v19, 0.0 }
 0x993   : > { %v2815_v18 = vpack.c.bf16 %v2813_v13, %v2812_v12 }
 0x994   : > { %v2814_v20 = vpack.c.bf16 %v2811_v15, %v2810_v14 }
 0x996   : > { %3873 = vmatprep.mubr.msk.bf16.mxu1 %vm2418_vm1, %v2814_v20 }
 0x997   : > { %3874 = vmatmul.mubr.msk.bf16.vlgmr.msra.gmra.mrb[44].mxu1 %vm2418_vm1, %v2815_v18 }
 0xa6a   : > { %v3875_v22 = vpop.f32.mrb[44].mxu1  ;;  %2901 = sbr.rel (%p3730_p4) target bundleno = 2675 (0xa73), region = 152 }
 0xa6b   : > { %v2888_v23 = vadd.f32 %v3875_v22, %v3725_v21  ;;  %v2879_v24 = vpop.f32.mrb[45].mxu1 }
 0xa6c   : > { %v2880_v25 = vadd.f32 %v3725_v21, %v2879_v24  ;;  %v3876_v26 = vpop.f32.mrb[46].mxu1 }
 0xa6d   : > { %v5398_v27 = vadd.f32 %v2888_v23, %v2728_v1  ;;  %v2891_v28 = vadd.f32 %v3876_v26, %v3725_v21  ;;  %v2882_v29 = vpop.f32.mrb[47].mxu1 }
 0xa6e   : > { %v2894_v30 = vadd.f32 %v2880_v25, %v2726_v63  ;;  %v2883_v31 = vadd.f32 %v3725_v21, %v2882_v29 }
 0xa6f   : > { %v5400_v32 = vadd.f32 %v2891_v28, %v2729_v62  ;;  %2904 = vst.msk [vmem:[#allocation2 + $0x10] sm:$0xff] (!%p3730_p4), %vm2418_vm1, %v5398_v27 }
 0xa70   : > { %v2895_v33 = vadd.f32 %v2883_v31, %v2727_v0  ;;  %2902 = vst.msk [vmem:[#allocation2] sm:$0xff] (!%p3730_p4), %vm2418_vm1, %v2894_v30 }
 0xa71   : > { %2905 = vst.msk [vmem:[#allocation2 + $0x18] sm:$0xff] %vm2418_vm1, %v5400_v32 }
 0xa72   : > { %2903 = vst.msk [vmem:[#allocation2 + $0x8] sm:$0xff] %vm2418_vm1, %v2895_v33 }
 0xa73 PF: > { %p3731_p8 = scmp.ne.s32.totalorder %s4804_s2, 1 }
 0xa74   : > { %v3884_v35 = vpack.c.bf16 (!%p3731_p8), %v2895_v33, %v2894_v30  ;;  %vm3885_vm4 = vmpackc.low (!%p3731_p8), %vm2418_vm1, %vm2418_vm1  ;;  %v3083_v37 = vmul.f32 (!%p3731_p8), %v5400_v32, %v5400_v32  ;;  %v3069_v42 = vmul.f32 (!%p3731_p8), %v5398_v27, %v5398_v27  ;;  %vm3006_vm13 = vcmask (!%p3731_p8), 97280   ;;  %s3097_s7 = sld [smem:[#allocation3]] (!%p3731_p8) }
 0xa75   : > { %2914 = sbr.rel (%p3731_p8) target bundleno = 3361 (0xd21), region = 156  ;;  %vm3134_vm14 = vcmask (!%p3731_p8), 7168   ;;  %vm3148_vm15 = vcmask (!%p3731_p8), 0  }
 0xa76   : > { %3886 = vmatprep.subr.msk.bf16.mxu0 (!%p3731_p8), %vm3885_vm4, %v3884_v35  ;;  %v3084_v41 = vsel (!%p3731_p8), %vm2418_vm1, %v3083_v37, 0.0  ;;  %v3070_v46 = vsel (!%p3731_p8), %vm2418_vm1, %v3069_v42, 0.0 }
 0xa77   : > { %3889 = vmatpush3.bf16.xpose.msk.msra.mxu0 (!%p3731_p8), %vm3885_vm4, %v3884_v35  ;;  %3085 = vadd.xlane.f32.xlu1 (!%p3731_p8), %v3084_v41 }
 0xa78   : > { %v5415_v38 = vld [vmem:[#allocation2 + $0x10] sm:$0xff] (!%p3731_p8) }
 0xa79   : > { %v2915_v36 = vld [vmem:[#allocation2] sm:$0xff] (!%p3731_p8)  ;;  %v3041_v40 = vmul.f32 (!%p3731_p8), %v5415_v38, %v5415_v38  ;;  %v2916_v47 = vld [vmem:[#allocation2 + $0x8] sm:$0xff] (!%p3731_p8) }
 0xa7a   : > { %3881 = vmatprep.mubr.msk.f32.mxu0 (!%p3731_p8), %vm2418_vm1, %v2915_v36  ;;  %v5417_v39 = vld [vmem:[#allocation2 + $0x18] sm:$0xff] (!%p3731_p8)  ;;  %v3098_v34 = vstv (!%p3731_p8), %s3097_s7 }
 0xa7b   : > { %v3055_v43 = vmul.f32 (!%p3731_p8), %v5417_v39, %v5417_v39  ;;  %v3042_v44 = vsel (!%p3731_p8), %vm2418_vm1, %v3041_v40, 0.0 }
 0xa7c   : > { %3043 = vadd.xlane.f32.xlu0 %v3042_v44 }
 0xa7d   : > { %v3056_v45 = vsel %vm2418_vm1, %v3055_v43, 0.0 }
 0xa7e   : > { %3057 = vadd.xlane.f32.xlu1 %v3056_v45  ;;  %3882 = vmatmul.mubr.msk.f32.vlgmr.msra.gmra.mrb[0].mxu0 %vm2418_vm1, %v2916_v47 }
 0xa80   : > { %3071 = vadd.xlane.f32.xlu0 %v3070_v46 }
 0xb04   : > { %v3086_v49 = vpop.xlane.xlu1 %3085 }
 0xb05   : > { %4198 = vrsqrt.f32 %v3086_v49  ;;  %vm3089_vm5 = vcmp.eq.f32.partialorder %v3086_v49, inf  ;;  %v3092_v59 = vand.u32 2147483648, %v3086_v49  ;;  %vm3091_vm8 = vcmp.eq.f32.partialorder %v3086_v49, 0.0 }
 0xb09   : > { %v3044_v48 = vpop.xlane.xlu0 %3043 }
 0xb0a   : > { %4200 = vrsqrt.f32 %v3044_v48  ;;  %vm3047_vm6 = vcmp.eq.f32.partialorder %v3044_v48, inf  ;;  %v3050_v60 = vand.u32 2147483648, %v3044_v48  ;;  %vm3049_vm9 = vcmp.eq.f32.partialorder %v3044_v48, 0.0 }
 0xb0b   : > { %v3058_v51 = vpop.xlane.xlu1 %3057 }
 0xb0c   : > { %vm3061_vm11 = vcmp.eq.f32.partialorder %v3058_v51, inf  ;;  %v3064_v4 = vand.u32 2147483648, %v3058_v51  ;;  %vm3063_vm12 = vcmp.eq.f32.partialorder %v3058_v51, 0.0 }
 0xb0d   : > { %v3072_v50 = vpop.xlane.xlu0 %3071 }
 0xb0e   : > { %4202 = vrsqrt.f32 %v3072_v50  ;;  %vm3075_vm7 = vcmp.eq.f32.partialorder %v3072_v50, inf  ;;  %v3078_v63 = vand.u32 2147483648, %v3072_v50  ;;  %vm3077_vm10 = vcmp.eq.f32.partialorder %v3072_v50, 0.0 }
 0xb0f   : > { %4204 = vrsqrt.f32 %v3058_v51  ;;  %v4199_v52 = vpop.eup %4198 }
 0xb10   : > { %v3088_v55 = vmul.f32 %v4199_v52, %v3086_v49 }
 0xb12   : > { %v3090_v61 = vsel %vm3089_vm5, %v3086_v49, %v3088_v55 }
 0xb13   : > { %v3093_v2 = vsel %vm3091_vm8, %v3092_v59, %v3090_v61 }
 0xb14   : > { %v4201_v53 = vpop.eup %4200  ;;  %v3094_v7 = vmax.f32 %v3093_v2, 1e-12 }
 0xb15   : > { %v3046_v56 = vmul.f32 %v4201_v53, %v3044_v48 }
 0xb16   : > { %4206 = vrcp.f32 %v3094_v7 }
 0xb17   : > { %v3048_v62 = vsel %vm3047_vm6, %v3044_v48, %v3046_v56 }
 0xb18   : > { %v4203_v54 = vpop.eup %4202  ;;  %v3051_v3 = vsel %vm3049_vm9, %v3050_v60, %v3048_v62 }
 0xb19   : > { %v3074_v57 = vmul.f32 %v4203_v54, %v3072_v50  ;;  %v4205_v58 = vpop.eup %4204  ;;  %v3052_v8 = vmax.f32 %v3051_v3, 1e-12 }
 0xb1a   : > { %v3060_v0 = vmul.f32 %v4205_v58, %v3058_v51 }
 0xb1b   : > { %v3076_v1 = vsel %vm3075_vm7, %v3072_v50, %v3074_v57  ;;  %4208 = vrcp.f32 %v3052_v8 }
 0xb1c   : > { %v3079_v5 = vsel %vm3077_vm10, %v3078_v63, %v3076_v1  ;;  %v3062_v6 = vsel %vm3061_vm11, %v3058_v51, %v3060_v0 }
 0xb1d   : > { %v3080_v9 = vmax.f32 %v3079_v5, 1e-12  ;;  %v3065_v10 = vsel %vm3063_vm12, %v3064_v4, %v3062_v6 }
 0xb1e   : > { %v3066_v11 = vmax.f32 %v3065_v10, 1e-12 }
 0xb1f   : > { %4210 = vrcp.f32 %v3080_v9 }
 0xb20   : > { %4212 = vrcp.f32 %v3066_v11  ;;  %v4207_v17 = vpop.eup %4206 }
 0xb21   : > { %v3096_v13 = vmul.f32 %v4207_v17, %v5400_v32  ;;  %4214 = vrcp.f32 %v3098_v34 }
 0xb25   : > { %v4209_v16 = vpop.eup %4208 }
 0xb26   : > { %v3054_v12 = vmul.f32 %v4209_v16, %v5415_v38 }
 0xb28   : > { %v3107_v23 = vmul.f32 %v3096_v13, %v3054_v12 }
 0xb29   : > { %v4211_v19 = vpop.eup %4210 }
 0xb2a   : > { %v3082_v14 = vmul.f32 %v4211_v19, %v5398_v27  ;;  %v4213_v15 = vpop.eup %4212  ;;  %v3108_v30 = vsel %vm2418_vm1, %v3107_v23, 0.0 }
 0xb2b   : > { %v3068_v27 = vmul.f32 %v4213_v15, %v5417_v39  ;;  %v4215_v49 = vpop.eup %4214 }
 0xb2c   : > { %v3101_v26 = vmul.f32 %v3082_v14, %v3054_v12 }
 0xb2d   : > { %v3112_v32 = vmul.f32 %v3082_v14, %v3068_v27 }
 0xb2e   : > { %v3102_v31 = vsel %vm2418_vm1, %v3101_v26, 0.0 }
 0xb2f   : > { %v3113_v33 = vsel %vm2418_vm1, %v3112_v32, 0.0 }
 0xb51   : > { %v5433_v18 = vpop.f32.mrb[0].mxu0 }
 0xb52   : > { %v5435_v20 = vpop.f32.mrb[1].mxu0  ;;  %v3021_v21 = vsel %vm3006_vm13, %v5433_v18, -inf  ;;  %v3008_v22 = vsel %vm3006_vm13, %v5433_v18, inf }
 0xb53   : > { %v3007_v24 = vsel %vm3006_vm13, %v5435_v20, inf  ;;  %v3020_v25 = vsel %vm3006_vm13, %v5435_v20, -inf }
 0xb54   : > { %v3022_v28 = vmax.f32 %v3020_v25, %v3021_v21  ;;  %v3009_v29 = vmin.f32 %v3007_v24, %v3008_v22 }
 0xb56   : > { %3023 = vmax.xlane.f32.xlu1 %v3022_v28  ;;  %3010 = vmin.xlane.f32.xlu0 %v3009_v29 }
 0xb5a   : > { %3109 = vadd.xlane.f32.xlu1 %v3108_v30  ;;  %3103 = vadd.xlane.f32.xlu0 %v3102_v31 }
 0xb5e   : > { %3114 = vadd.xlane.f32.xlu0 %v3113_v33 }
 0xbe3   : > { %v3024_v35 = vpop.xlane.xlu1 %3023  ;;  %v3011_v36 = vpop.xlane.xlu0 %3010 }
 0xbe4   : > { %v3025_v37 = vrot.slane %v3024_v35, 4  ;;  %v3012_v38 = vrot.slane %v3011_v36, 4 }
 0xbe6   : > { %v3026_v39 = vmax.f32 %v3024_v35, %v3025_v37  ;;  %v3013_v40 = vmin.f32 %v3011_v36, %v3012_v38 }
 0xbe7   : > { %v3104_v50 = vpop.xlane.xlu0 %3103  ;;  %v3110_v53 = vpop.xlane.xlu1 %3109 }
 0xbe8   : > { %v3027_v41 = vrot.slane %v3026_v39, 2  ;;  %v3014_v42 = vrot.slane %v3013_v40, 2 }
 0xbea   : > { %v3015_v43 = vmin.f32 %v3013_v40, %v3014_v42  ;;  %v3028_v44 = vmax.f32 %v3026_v39, %v3027_v41 }
 0xbeb   : > { %v3115_v58 = vpop.xlane.xlu0 %3114 }
 0xbec   : > { %v3016_v45 = vrot.slane %v3015_v43, 1  ;;  %v3029_v46 = vrot.slane %v3028_v44, 1 }
 0xbee   : > { %v3017_v47 = vmin.f32 %v3015_v43, %v3016_v45  ;;  %v3030_v48 = vmax.f32 %v3028_v44, %v3029_v46 }
 0xbf0   : > { %3906 = vpush %v3017_v47 }
 0xbf1   : > { %3908 = vpush %v3030_v48 }
 0xbf2   : > { %3910 = vpush %v4215_v49 }
 0xc21   : > { %s3907_s29 = spop %3906 }
 0xc22   : > { %v3019_v51 = vstv %s3907_s29  ;;  %s3909_s3 = spop %3908 }
 0xc23   : > { %v3032_v52 = vstv %s3909_s3  ;;  %s3911_s23 = spop %3910  ;;  %v3033_v4 = vsub.f32 %v5435_v20, %v3019_v51  ;;  %v3034_v5 = vsub.f32 %v5433_v18, %v3019_v51 }
 0xc24   : > { %v3035_v54 = vsub.f32 %v3032_v52, %v3019_v51  ;;  %v3105_v55 = vstv %s3911_s23 }
 0xc25   : > { %v3106_v56 = vmul.f32 %v3105_v55, %v3104_v50  ;;  %v3111_v57 = vmul.f32 %v3110_v53, %v3105_v55  ;;  %v3116_v59 = vmul.f32 %v3115_v58, %v3105_v55 }
 0xc26   : > { %4216 = vrcp.f32 %v3035_v54 }
 0xc27   : > { %v3117_v60 = vmax.f32 %v3106_v56, %v3111_v57 }
 0xc29   : > { %v3118_v61 = vmax.f32 %v3117_v60, %v3116_v59 }
 0xc2b   : > { %v3119_v62 = vsub.f32 %v3106_v56, %v3118_v61  ;;  %v3122_v63 = vsub.f32 %v3111_v57, %v3118_v61  ;;  %v3126_v0 = vsub.f32 %v3116_v59, %v3118_v61 }
 0xc2d   : > { %v3120_v1 = vmul.f32 1.442695, %v3119_v62  ;;  %v3123_v2 = vmul.f32 1.442695, %v3122_v63  ;;  %v3127_v3 = vmul.f32 1.442695, %v3126_v0 }
 0xc2f   : > { %4218 = vpow2.f32 %v3120_v1 }
 0xc30   : > { %v4217_v6 = vpop.eup %4216  ;;  %4220 = vpow2.f32 %v3123_v2 }
 0xc31   : > { %v3037_v7 = vmul.f32 %v4217_v6, %v3033_v4  ;;  %v3038_v8 = vmul.f32 %v4217_v6, %v3034_v5  ;;  %4222 = vpow2.f32 %v3127_v3 }
 0xc33   : > { %3039 = vst.msk [vmem:[#allocation21] sm:$0xff] %vm3006_vm13, %v3037_v7  ;;  %3040 = vst.msk [vmem:[#allocation21 + $0x8] sm:$0xff] %vm3006_vm13, %v3038_v8 }
 0xc39   : > { %v4219_v9 = vpop.eup %4218 }
 0xc3a   : > { %v4221_v10 = vpop.eup %4220 }
 0xc3b   : > { %v3125_v11 = vadd.f32 %v4221_v10, %v4219_v9  ;;  %v4223_v17 = vpop.eup %4222 }
 0xc3d   : > { %v3129_v16 = vadd.f32 %v4223_v17, %v3125_v11 }
 0xc3f   : > { %4224 = vlog2.f32 %v3129_v16 }
 0xc49   : > { %v4225_v19 = vpop.eup %4224 }
 0xc4a   : > { %v3131_v12 = vmul.f32 0.6931472, %v4225_v19 }
 0xc4c   : > { %v3132_v13 = vadd.f32 %v3131_v12, %v3118_v61 }
 0xc4e   : > { %v3133_v14 = vsub.f32 %v3132_v13, %v3106_v56 }
 0xc50   : > { %v3135_v15 = vsel %vm3134_vm14, %v3133_v14, 0.0 }
 0xc51   : > { %3136 = vadd.xlane.f32.xlu1 %v3135_v15 }
 0xcde   : > { %v3137_v18 = vpop.xlane.xlu1 %3136 }
 0xcdf   : > { %v3138_v20 = vrot.slane %v3137_v18, 4 }
 0xce1   : > { %v3139_v21 = vadd.f32 %v3138_v20, %v3137_v18 }
 0xce3   : > { %v3140_v22 = vrot.slane %v3139_v21, 2 }
 0xce5   : > { %v3141_v23 = vadd.f32 %v3140_v22, %v3139_v21 }
 0xce7   : > { %v3142_v24 = vrot.slane %v3141_v23, 1 }
 0xce9   : > { %v3143_v25 = vadd.f32 %v3142_v24, %v3141_v23 }
 0xceb   : > { %3912 = vpush %v3143_v25 }
 0xd1c   : > { %s3913_s28 = spop %3912 }
 0xd1d   : > { %v3145_v26 = vstv %s3913_s28 }
 0xd1e   : > { %v3147_v27 = vmul.f32 0.125, %v3145_v26 }
 0xd20   : > { %3149 = vst.msk [vmem:[#allocation22] sm:$0x1] %vm3148_vm15, %v3147_v27 }
 0xd21 PF: > { %p3974_p9 = scmp.eq.s32.totalorder %s4804_s2, 1  ;;  %s4658_s0 = smov [#allocation21]  }
 0xd22   : > { %s3156_s1 = sshll.u32 %s4658_s0, 4  ;;  %s3157_s1 = int_to_ptr.vmem [resolvable:$true] %s3156_s1 }
 0xd23   : > { %s4526_s12 = scalar_lea.vmem %s3157_s1, 256  ;;  %p4533_p1 = scmp.lt.s32.totalorder %s3157_s1, %s3157_s1 }
 0xd24   : > { %p4527_p11 = scmp.ne.s32.totalorder %s3157_s1, %s4526_s12  ;;  %p4534_p13 = scmp.lt.s32.totalorder %s4526_s12, %s4526_s12 }
 0xd26   : > { %p4528_p6 = pnand %p4527_p11, %p3974_p9  ;;  %p4535_p2 = por %p4534_p13, %p4533_p1 }
 0xd28   : > { %p4529_p0 = pneg %p4528_p6 }
 0xd2a   : > { %p4536_p3 = pnand %p4535_p2, %p4529_p0 }
 0xd2c   : > { %4539 = shalt.err (!%p4536_p3)
}
 0xd2d   : > { %s5611_s22 = sld [smem:[#allocation52_spill]] }
 0xd33   : > { %s4540_s16 = scalar_lea.hbm %s5611_s22, 256 }
 0xd34   : > { %p4541_p5 = scmp.ne.s32.totalorder %s5611_s22, %s4540_s16  ;;  %p4546_p12 = scmp.lt.u32.totalorder %s4540_s16, %s5611_s22 }
 0xd36   : > { %p4542_p10 = pnand %p4541_p5, %p3974_p9 }
 0xd38   : > { %p4543_p7 = pneg %p4542_p10 }
 0xd3a   : > { %p4548_p4 = pnand %p4546_p12, %p4543_p7 }
 0xd3c   : > { %4551 = shalt.err (!%p4548_p4)
}
 0xd3d   : > { %s4659_s26 = smov 128   ;;  %s4660_s25 = smov 8  }
 0xd3e   : > { %3935 = dma.vmem_to_hbm [thread:$0]  (%p3974_p9), %s3157_s1, 256, %s5611_s22, [#allocation6], %s4659_s26, %s4659_s26, %s4660_s25  }
 0xd3f   : > { %s4661_s6 = smov [#allocation22]  }
 0xd40   : > { %s3170_s27 = sshll.u32 %s4661_s6, 4  ;;  %s3171_s27 = int_to_ptr.vmem [resolvable:$true] %s3170_s27 }
 0xd41   : > { %s4552_s13 = scalar_lea.vmem %s3171_s27, 16  ;;  %s4558_s7 = scalar_lea.vmem %s3171_s27, 32 }
 0xd42   : > { %p4553_p8 = scmp.ne.s32.totalorder %s3171_s27, %s4552_s13  ;;  %p4559_p0 = scmp.lt.s32.totalorder %s3171_s27, %s3171_s27 }
 0xd43   : > { %p4560_p1 = scmp.lt.s32.totalorder %s4558_s7, %s4552_s13 }
 0xd44   : > { %p4554_p11 = pnand %p4553_p8, %p3974_p9 }
 0xd45   : > { %p4561_p13 = por %p4560_p1, %p4559_p0 }
 0xd46   : > { %p4555_p6 = pneg %p4554_p11 }
 0xd48   : > { %p4562_p2 = pnand %p4561_p13, %p4555_p6 }
 0xd4a   : > { %4565 = shalt.err (!%p4562_p2)
}
 0xd4b   : > { %s5612_s23 = sld [smem:[#allocation53_spill]] }
 0xd51   : > { %s4566_s28 = scalar_lea.hbm %s5612_s23, 16 }
 0xd52   : > { %p4567_p3 = scmp.ne.s32.totalorder %s5612_s23, %s4566_s28  ;;  %p4572_p7 = scmp.lt.u32.totalorder %s4566_s28, %s5612_s23 }
 0xd54   : > { %p4568_p5 = pnand %p4567_p3, %p3974_p9 }
 0xd56   : > { %p4569_p10 = pneg %p4568_p5 }
 0xd58   : > { %p4574_p12 = pnand %p4572_p7, %p4569_p10 }
 0xd5a   : > { %4577 = shalt.err (!%p4574_p12)
}
 0xd5b   : > { %3937 = dma.vmem_to_hbm [thread:$0]  (%p3974_p9), %s3171_s27, 16, %s5612_s23, [#allocation23]  }
 0xd5c   : > { %4619 = dma.done.wait (%p3974_p9), [#allocation6], 256  }
 0xd5d   : > { %4621 = vsyncadd (%p3974_p9), [#allocation6], 4294967040 }
 0xd5e   : > { %4623 = dma.done.wait (%p3974_p9), [#allocation23], 16  }
 0xd5f   : > { %4625 = vsyncadd (%p3974_p9), [#allocation23], 4294967280 }
 0xd60 PF: > { %s5613_s26 = sld [smem:[#allocation33_spill]]  ;;  %s5614_s14 = sld [smem:[#allocation32_spill]] }
 0xd61   : > { %s5615_s1 = sld [smem:[#allocation34_spill]]  ;;  %s5616_s25 = smov %s4632_s5 }
 0xd66   : > { %p52_p4 = scmp.ge.s32.totalorder %s5613_s26, 4   ;;  %s5617_s5 = smov %s5614_s14 }
 0xd68   :  { %54 = sbr.rel (!%p52_p4) target bundleno = 36 (0x24), region = 303 }
 0xd6f   :  { %3187 = vsyncpa [#allocation5], 1 }
 0xd70   :  { %3189 = vsyncpa [#allocation5 + $0x1], 1 }
 0xd71   :  { %3190 = vsyncpa [#allocation8], 1 }
 0xd72   :  { %3192 = vsyncpa [#allocation8 + $0x1], 1 }
 0xd73   :  { %3193 = vsyncpa [#allocation11], 1 }
 0xd74   :  { %3195 = vsyncpa [#allocation11 + $0x1], 1 }
 0xd75   :  { %3196 = vsyncpa [#allocation14], 1 }
 0xd76   :  { %3198 = vsyncpa [#allocation14 + $0x1], 1 }
 0xd77   :  { %3199 = vsyncpa [#allocation17], 1 }
 0xd78   :  { %3201 = vsyncpa [#allocation17 + $0x1], 1 }
 0xd79   :  { %3202 = vsyncpa [#allocation20], 1 }
 0xd7a   :  { %3204 = vsyncpa [#allocation20 + $0x1], 1 }
 0xd7b   :  { %3205 = vsyncpa [#allocation6], 1 }
 0xd7c   :  { %3207 = vsyncpa [#allocation6 + $0x1], 1 }
 0xd7d   :  { %3208 = vsyncpa [#allocation23], 1 }

</bundles_post_ra>
